<compile_context>
chip_gen: v7x
topology: tpu7x:2x2x1
jax: 0.10.0
libtpu: 0.0.40
codegen_flags: <defaults>
</compile_context>

<pallas_src>
import functools

import jax
import jax.numpy as jnp
from jax.experimental import pallas as pl
from jax.experimental.pallas import tpu as pltpu


# ------------------------------ Pallas kernels ------------------------------ #

def _fused_up_conv_kernel(x1r2_ref, x2_ref, wt4_ref, bt4_ref, wc9_ref, bc_ref,
                          y_ref, stats_ref, z_ref, im_ref,
                          *, C, H1, W1, H2, W2, Wp, py, px):
    """deconv(k=2,s=2) + pad + skip-add + 3x3 conv + BN partial sums, fused.

    Channel-major layout: channels on sublanes, flattened pixels on lanes, so
    x1/x2 arrive in native NCHW order and all stores are lane-dense.
    z = x2 + up lives only in the bf16 VMEM scratch z_ref (shape (C, Hp*Wp),
    Hp = H2+3: 1-px halo ring + one safety row).  The conv operand for tap
    (dh, dw) is z shifted by dh*Wp + dw lanes, so one wide-K matmul
    (O, 9C) x (9C, H2*Wp) performs the whole 3x3 conv.
    """
    Wu = 2 * W1
    HW1u = H1 * Wu          # lanes of the lane-duplicated x1
    R = H2 * Wp             # flattened conv-output pixels (incl. junk pad cols)
    f32 = jnp.float32
    bf16 = jnp.bfloat16

    # ---- z := zero-padded x2, built entirely in VMEM (no XLA pad pass) ----
    z_ref[...] = jnp.zeros_like(z_ref)
    for h in range(H2):
        z_ref[:, pl.ds((1 + h) * Wp + 1, W2)] = (
            x2_ref[:, pl.ds(h * W2, W2)].astype(bf16))

    # ---- ConvTranspose2d(k=2, s=2): ONE matmul over the lane-duplicated x1.
    # p[(2*kh+kw)*C + co, h1*Wu + l] = deconv tap (kh, kw) at x1 pixel
    # (h1, l // 2); bias already folded in (hoisted, added once).
    p = jnp.dot(wt4_ref[...], x1r2_ref[...],
                preferred_element_type=f32) + bt4_ref[...]
    even = (jax.lax.broadcasted_iota(jnp.int32, (1, HW1u), 1) % 2) == 0

    # ---- scatter-add `up` into z: the even/odd lane select realises the 2x2
    # column interleave, then one contiguous lane-slice store per up-row. ----
    for kh in range(2):
        v = jnp.where(even,
                      p[(2 * kh) * C:(2 * kh + 1) * C, :],
                      p[(2 * kh + 1) * C:(2 * kh + 2) * C, :])
        for h1 in range(H1):
            d = (1 + py + 2 * h1 + kh) * Wp + 1 + px
            z_ref[:, pl.ds(d, Wu)] = (
                z_ref[:, pl.ds(d, Wu)].astype(f32)
                + v[:, h1 * Wu:(h1 + 1) * Wu]).astype(bf16)

    # ---- im2col: nine lane-shifted copies of z, then ONE wide-K matmul ----
    for t in range(9):
        dh, dw = t // 3, t % 3
        im_ref[t * C:(t + 1) * C, :] = z_ref[:, pl.ds(dh * Wp + dw, R)]
    acc = jnp.dot(wc9_ref[...], im_ref[...],
                  preferred_element_type=f32) + bc_ref[...]

    # ---- per-batch BN partial sums over valid pixels only (keeps the batch
    # grid axis "parallel"; cross-batch reduction happens in the wrapper) ----
    valid = ((jax.lax.broadcasted_iota(jnp.int32, (1, R), 1) % Wp) < W2
             ).astype(f32)
    accv = acc * valid
    stats_ref[:, 0:1] = jnp.sum(accv, axis=1, keepdims=True)
    stats_ref[:, 1:2] = jnp.sum(accv * acc, axis=1, keepdims=True)

    y_ref[...] = acc.astype(y_ref.dtype)


def _bn_relu_pack_kernel(y_ref, scale_ref, shift_ref, o_ref, *, H2, W2, Wp):
    """Fused epilogue: folded BN affine + ReLU + junk-column drop + final
    NCHW float32 layout, all in a single pass over y."""
    v = jnp.maximum(y_ref[...].astype(jnp.float32) * scale_ref[...]
                    + shift_ref[...], 0.0)
    for h in range(H2):
        o_ref[:, pl.ds(h * W2, W2)] = v[:, h * Wp:h * Wp + W2]


# --------------------------------- wrapper ---------------------------------- #

def _compiler_params(block_bytes, scratch_bytes=0):
    # VMEM limit derived from the actual working set (double-buffered blocks +
    # scratch + headroom) instead of a blanket constant.
    ws = 2 * block_bytes + scratch_bytes
    limit = int(min(100 * 2**20, max(8 * 2**20, ws + 2 * 2**20)))
    return pltpu.CompilerParams(dimension_semantics=("parallel",),
                                vmem_limit_bytes=limit)


def up_single_forward(x1, x2, params, eps=1e-5):
    wt, bt, wc, bc, gamma, beta = (params[k] for k in
                                   ("wt", "bt", "wc", "bc", "gamma", "beta"))
    N, C, H1, W1 = x1.shape
    _, _, H2, W2 = x2.shape
    O = wc.shape[0]
    Wu = 2 * W1
    diffY, diffX = H2 - 2 * H1, W2 - Wu
    py, px = diffY // 2, diffX // 2

    Wp = W2 + 2          # padded row width shared by z and the conv output
    Hp = H2 + 3          # 1 top halo + H2 + 2 bottom (tap-slice safety row)
    R = H2 * Wp          # flattened conv-output pixels (incl. junk pad cols)

    # The only XLA pre-pass: lane-duplicate x1 (the smallest tensor) along W so
    # the 2x2 deconv interleave becomes matmul + even/odd lane select in-kernel.
    x1r2 = jnp.repeat(x1, 2, axis=3).reshape(N, C, H1 * Wu).astype(jnp.bfloat16)
    x2f = x2.reshape(N, C, H2 * W2)                 # free bitcast, stays f32

    # Tiny weight repacks.
    wt4 = jnp.transpose(wt, (2, 3, 1, 0)).reshape(4 * C, C).astype(jnp.bfloat16)
    bt4 = jnp.tile(bt, 4).reshape(4 * C, 1).astype(jnp.float32)
    wc9 = jnp.transpose(wc, (0, 2, 3, 1)).reshape(O, 9 * C).astype(jnp.bfloat16)
    bc1 = bc.reshape(O, 1).astype(jnp.float32)

    kernel = functools.partial(_fused_up_conv_kernel, C=C, H1=H1, W1=W1,
                               H2=H2, W2=W2, Wp=Wp, py=py, px=px)
    block_bytes = (C * H1 * Wu * 2 + C * H2 * W2 * 4 + 4 * C * C * 2
                   + 4 * C * 4 + O * 9 * C * 2 + O * 4 + O * R * 2 + O * 2 * 4)
    scratch_bytes = C * Hp * Wp * 2 + 9 * C * R * 2

    y, stats = pl.pallas_call(
        kernel,
        out_shape=(jax.ShapeDtypeStruct((N, O, R), jnp.bfloat16),
                   jax.ShapeDtypeStruct((N, O, 2), jnp.float32)),
        grid=(N,),
        in_specs=[
            pl.BlockSpec((None, C, H1 * Wu), lambda n: (n, 0, 0)),
            pl.BlockSpec((None, C, H2 * W2), lambda n: (n, 0, 0)),
            pl.BlockSpec((4 * C, C), lambda n: (0, 0)),
            pl.BlockSpec((4 * C, 1), lambda n: (0, 0)),
            pl.BlockSpec((O, 9 * C), lambda n: (0, 0)),
            pl.BlockSpec((O, 1), lambda n: (0, 0)),
        ],
        out_specs=(pl.BlockSpec((None, O, R), lambda n: (n, 0, 0)),
                   pl.BlockSpec((None, O, 2), lambda n: (n, 0, 0))),
        scratch_shapes=[pltpu.VMEM((C, Hp * Wp), jnp.bfloat16),
                        pltpu.VMEM((9 * C, R), jnp.bfloat16)],
        compiler_params=_compiler_params(block_bytes, scratch_bytes),
    )(x1r2, x2f, wt4, bt4, wc9, bc1)

    # ---- finalize training-mode BatchNorm stats (tiny (N, O, 2) reduction) ----
    tot = jnp.sum(stats, axis=0)                           # (O, 2)
    count = float(N * H2 * W2)
    mean = tot[:, 0] / count
    var = jnp.maximum(tot[:, 1] / count - mean * mean, 0.0)   # clamp (review)
    inv = jax.lax.rsqrt(var + eps)
    scale = (gamma * inv).reshape(O, 1).astype(jnp.float32)
    shift = (beta - mean * gamma * inv).reshape(O, 1).astype(jnp.float32)

    # ---- fused epilogue: BN affine + ReLU + junk-col drop + NCHW f32 ----
    epi = functools.partial(_bn_relu_pack_kernel, H2=H2, W2=W2, Wp=Wp)
    epi_block_bytes = O * R * 2 + 2 * O * 4 + O * H2 * W2 * 4
    out = pl.pallas_call(
        epi,
        out_shape=jax.ShapeDtypeStruct((N, O, H2 * W2), jnp.float32),
        grid=(N,),
        in_specs=[
            pl.BlockSpec((None, O, R), lambda n: (n, 0, 0)),
            pl.BlockSpec((O, 1), lambda n: (0, 0)),
            pl.BlockSpec((O, 1), lambda n: (0, 0)),
        ],
        out_specs=pl.BlockSpec((None, O, H2 * W2), lambda n: (n, 0, 0)),
        compiler_params=_compiler_params(epi_block_bytes),
    )(y, scale, shift)

    return out.reshape(N, O, H2, W2)


# ----------------------------- pure-JAX reference ---------------------------- #

def up_single_reference(x1, x2, params, eps=1e-5):
    wt, bt, wc, bc, gamma, beta = (params[k] for k in
                                   ("wt", "bt", "wc", "bc", "gamma", "beta"))
    N, C, H1, W1 = x1.shape
    _, _, H2, W2 = x2.shape
    hp = jax.lax.Precision.HIGHEST
    # ConvTranspose2d(k=2,s=2): out[n,o,2h+kh,2w+kw] = sum_c x[n,c,h,w]*wt[c,o,kh,kw] + bt
    t = jnp.einsum('nchw,coyx->nohywx', x1, wt, precision=hp)
    up = t.reshape(N, C, 2 * H1, 2 * W1) + bt[None, :, None, None]
    diffY, diffX = H2 - 2 * H1, W2 - 2 * W1
    up = jnp.pad(up, ((0, 0), (0, 0),
                      (diffY // 2, diffY - diffY // 2),
                      (diffX // 2, diffX - diffX // 2)))
    z = x2 + up
    y = jax.lax.conv_general_dilated(
        z, wc, window_strides=(1, 1), padding=((1, 1), (1, 1)),
        dimension_numbers=('NCHW', 'OIHW', 'NCHW'), precision=hp)
    y = y + bc[None, :, None, None]
    mu = jnp.mean(y, axis=(0, 2, 3), keepdims=True)
    var = jnp.mean((y - mu) ** 2, axis=(0, 2, 3), keepdims=True)
    yhat = (y - mu) * jax.lax.rsqrt(var + eps)
    out = yhat * gamma[None, :, None, None] + beta[None, :, None, None]
    return jnp.maximum(out, 0.0)


# ------------------------------------ main ----------------------------------- #

if __name__ == "__main__":
    key = jax.random.PRNGKey(0)
    N, C_in, C_out = 2, 8, 8
    H1 = W1 = 8          # x1 spatial (gets upsampled 2x)
    H2 = W2 = 16         # x2 spatial
    ks = jax.random.split(key, 6)
    params = dict(
        wt=jax.random.normal(ks[0], (C_in, C_in, 2, 2), jnp.float32)
           * (1.0 / (C_in * 4) ** 0.5),
        bt=jax.random.normal(ks[1], (C_in,), jnp.float32) * 0.1,
        wc=jax.random.normal(ks[2], (C_out, C_in, 3, 3), jnp.float32)
           * (1.0 / (C_in * 9) ** 0.5),
        bc=jax.random.normal(ks[3], (C_out,), jnp.float32) * 0.1,
        gamma=jnp.ones((C_out,), jnp.float32),   # BatchNorm2d default init
        beta=jnp.zeros((C_out,), jnp.float32),
    )
    x1 = jax.random.normal(ks[4], (N, C_in, H1, W1), jnp.float32)
    x2 = jax.random.normal(ks[5], (N, C_in, H2, W2), jnp.float32)

    fwd = jax.jit(up_single_forward)
    out = jax.block_until_ready(fwd(x1, x2, params))
    assert out.shape == (N, C_out, H2, W2)

    ref = up_single_reference(x1, x2, params)
    max_err = float(jnp.max(jnp.abs(out - ref)))
    mean_err = float(jnp.mean(jnp.abs(out - ref)))
    # bf16 activations/weights (fp32 accumulation) -> relaxed tolerance vs fp32 ref.
    assert max_err < 5e-2 and mean_err < 1e-2, f"max {max_err} mean {mean_err}"

    print("KERNEL_OK")
</pallas_src>

<mosaic_0001>
module attributes {stable_mosaic.version = 11 : i64} {
  func.func @_bn_relu_pack_kernel(%arg0: i32, %arg1: memref<1x8x288xbf16, #tpu.memory_space<vmem>>, %arg2: memref<8x1xf32, #tpu.memory_space<vmem>>, %arg3: memref<8x1xf32, #tpu.memory_space<vmem>>, %arg4: memref<1x8x256xf32, #tpu.memory_space<vmem>>) attributes {dimension_semantics = [#tpu.dimension_semantics<parallel>], iteration_bounds = array<i64: 2>, scalar_prefetch = 0 : i64, scratch_operands = 0 : i64, tpu.core_type = #tpu.core_type<tc>, window_params = [{transform_indices = @transform_0, window_bounds = array<i64: 1, 8, 288>}, {pipeline_mode = #tpu.pipeline_mode<synchronous>, transform_indices = @transform_1, window_bounds = array<i64: 8, 1>}, {pipeline_mode = #tpu.pipeline_mode<synchronous>, transform_indices = @transform_2, window_bounds = array<i64: 8, 1>}, {transform_indices = @transform_3, window_bounds = array<i64: 1, 8, 256>}]} {
    %c0 = arith.constant 0 : index
    %c0_0 = arith.constant 0 : index
    %c0_1 = arith.constant 0 : index
    %0 = vector.load %arg1[%c0, %c0_0, %c0_1] : memref<1x8x288xbf16, #tpu.memory_space<vmem>>, vector<1x8x288xbf16>
    %1 = vector.shape_cast %0 : vector<1x8x288xbf16> to vector<8x288xbf16>
    %2 = arith.extf %1 : vector<8x288xbf16> to vector<8x288xf32>
    %c0_2 = arith.constant 0 : index
    %c0_3 = arith.constant 0 : index
    %3 = vector.load %arg2[%c0_2, %c0_3] : memref<8x1xf32, #tpu.memory_space<vmem>>, vector<8x1xf32>
    %4 = vector.broadcast %3 : vector<8x1xf32> to vector<8x288xf32>
    %5 = arith.mulf %2, %4 : vector<8x288xf32>
    %c0_4 = arith.constant 0 : index
    %c0_5 = arith.constant 0 : index
    %6 = vector.load %arg3[%c0_4, %c0_5] : memref<8x1xf32, #tpu.memory_space<vmem>>, vector<8x1xf32>
    %7 = vector.broadcast %6 : vector<8x1xf32> to vector<8x288xf32>
    %8 = arith.addf %5, %7 : vector<8x288xf32>
    %cst = arith.constant 0.000000e+00 : f32
    %9 = vector.broadcast %cst : f32 to vector<8x288xf32>
    %10 = arith.maximumf %8, %9 : vector<8x288xf32>
    %11 = vector.extract_strided_slice %10 {offsets = [0, 0], sizes = [8, 16], strides = [1, 1]} : vector<8x288xf32> to vector<8x16xf32>
    %c0_6 = arith.constant 0 : index
    %c0_7 = arith.constant 0 : index
    %c0_8 = arith.constant 0 : index
    %12 = vector.load %arg4[%c0_6, %c0_7, %c0_8] : memref<1x8x256xf32, #tpu.memory_space<vmem>>, vector<1x8x16xf32>
    %13 = vector.shape_cast %12 : vector<1x8x16xf32> to vector<8x16xf32>
    %14 = vector.shape_cast %11 : vector<8x16xf32> to vector<1x8x16xf32>
    tpu.vector_store %arg4[%c0_6, %c0_7, %c0_8], %14 {strides = array<i32>} : memref<1x8x256xf32, #tpu.memory_space<vmem>>, vector<1x8x16xf32>,
    %15 = vector.extract_strided_slice %10 {offsets = [0, 18], sizes = [8, 16], strides = [1, 1]} : vector<8x288xf32> to vector<8x16xf32>
    %c0_9 = arith.constant 0 : index
    %c0_10 = arith.constant 0 : index
    %c16 = arith.constant 16 : index
    %16 = vector.load %arg4[%c0_9, %c0_10, %c16] : memref<1x8x256xf32, #tpu.memory_space<vmem>>, vector<1x8x16xf32>
    %17 = vector.shape_cast %16 : vector<1x8x16xf32> to vector<8x16xf32>
    %18 = vector.shape_cast %15 : vector<8x16xf32> to vector<1x8x16xf32>
    tpu.vector_store %arg4[%c0_9, %c0_10, %c16], %18 {strides = array<i32>} : memref<1x8x256xf32, #tpu.memory_space<vmem>>, vector<1x8x16xf32>,
    %19 = vector.extract_strided_slice %10 {offsets = [0, 36], sizes = [8, 16], strides = [1, 1]} : vector<8x288xf32> to vector<8x16xf32>
    %c0_11 = arith.constant 0 : index
    %c0_12 = arith.constant 0 : index
    %c32 = arith.constant 32 : index
    %20 = vector.load %arg4[%c0_11, %c0_12, %c32] : memref<1x8x256xf32, #tpu.memory_space<vmem>>, vector<1x8x16xf32>
    %21 = vector.shape_cast %20 : vector<1x8x16xf32> to vector<8x16xf32>
    %22 = vector.shape_cast %19 : vector<8x16xf32> to vector<1x8x16xf32>
    tpu.vector_store %arg4[%c0_11, %c0_12, %c32], %22 {strides = array<i32>} : memref<1x8x256xf32, #tpu.memory_space<vmem>>, vector<1x8x16xf32>,
    %23 = vector.extract_strided_slice %10 {offsets = [0, 54], sizes = [8, 16], strides = [1, 1]} : vector<8x288xf32> to vector<8x16xf32>
    %c0_13 = arith.constant 0 : index
    %c0_14 = arith.constant 0 : index
    %c48 = arith.constant 48 : index
    %24 = vector.load %arg4[%c0_13, %c0_14, %c48] : memref<1x8x256xf32, #tpu.memory_space<vmem>>, vector<1x8x16xf32>
    %25 = vector.shape_cast %24 : vector<1x8x16xf32> to vector<8x16xf32>
    %26 = vector.shape_cast %23 : vector<8x16xf32> to vector<1x8x16xf32>
    tpu.vector_store %arg4[%c0_13, %c0_14, %c48], %26 {strides = array<i32>} : memref<1x8x256xf32, #tpu.memory_space<vmem>>, vector<1x8x16xf32>,
    %27 = vector.extract_strided_slice %10 {offsets = [0, 72], sizes = [8, 16], strides = [1, 1]} : vector<8x288xf32> to vector<8x16xf32>
    %c0_15 = arith.constant 0 : index
    %c0_16 = arith.constant 0 : index
    %c64 = arith.constant 64 : index
    %28 = vector.load %arg4[%c0_15, %c0_16, %c64] : memref<1x8x256xf32, #tpu.memory_space<vmem>>, vector<1x8x16xf32>
    %29 = vector.shape_cast %28 : vector<1x8x16xf32> to vector<8x16xf32>
    %30 = vector.shape_cast %27 : vector<8x16xf32> to vector<1x8x16xf32>
    tpu.vector_store %arg4[%c0_15, %c0_16, %c64], %30 {strides = array<i32>} : memref<1x8x256xf32, #tpu.memory_space<vmem>>, vector<1x8x16xf32>,
    %31 = vector.extract_strided_slice %10 {offsets = [0, 90], sizes = [8, 16], strides = [1, 1]} : vector<8x288xf32> to vector<8x16xf32>
    %c0_17 = arith.constant 0 : index
    %c0_18 = arith.constant 0 : index
    %c80 = arith.constant 80 : index
    %32 = vector.load %arg4[%c0_17, %c0_18, %c80] : memref<1x8x256xf32, #tpu.memory_space<vmem>>, vector<1x8x16xf32>
    %33 = vector.shape_cast %32 : vector<1x8x16xf32> to vector<8x16xf32>
    %34 = vector.shape_cast %31 : vector<8x16xf32> to vector<1x8x16xf32>
    tpu.vector_store %arg4[%c0_17, %c0_18, %c80], %34 {strides = array<i32>} : memref<1x8x256xf32, #tpu.memory_space<vmem>>, vector<1x8x16xf32>,
    %35 = vector.extract_strided_slice %10 {offsets = [0, 108], sizes = [8, 16], strides = [1, 1]} : vector<8x288xf32> to vector<8x16xf32>
    %c0_19 = arith.constant 0 : index
    %c0_20 = arith.constant 0 : index
    %c96 = arith.constant 96 : index
    %36 = vector.load %arg4[%c0_19, %c0_20, %c96] : memref<1x8x256xf32, #tpu.memory_space<vmem>>, vector<1x8x16xf32>
    %37 = vector.shape_cast %36 : vector<1x8x16xf32> to vector<8x16xf32>
    %38 = vector.shape_cast %35 : vector<8x16xf32> to vector<1x8x16xf32>
    tpu.vector_store %arg4[%c0_19, %c0_20, %c96], %38 {strides = array<i32>} : memref<1x8x256xf32, #tpu.memory_space<vmem>>, vector<1x8x16xf32>,
    %39 = vector.extract_strided_slice %10 {offsets = [0, 126], sizes = [8, 16], strides = [1, 1]} : vector<8x288xf32> to vector<8x16xf32>
    %c0_21 = arith.constant 0 : index
    %c0_22 = arith.constant 0 : index
    %c112 = arith.constant 112 : index
    %40 = vector.load %arg4[%c0_21, %c0_22, %c112] : memref<1x8x256xf32, #tpu.memory_space<vmem>>, vector<1x8x16xf32>
    %41 = vector.shape_cast %40 : vector<1x8x16xf32> to vector<8x16xf32>
    %42 = vector.shape_cast %39 : vector<8x16xf32> to vector<1x8x16xf32>
    tpu.vector_store %arg4[%c0_21, %c0_22, %c112], %42 {strides = array<i32>} : memref<1x8x256xf32, #tpu.memory_space<vmem>>, vector<1x8x16xf32>,
    %43 = vector.extract_strided_slice %10 {offsets = [0, 144], sizes = [8, 16], strides = [1, 1]} : vector<8x288xf32> to vector<8x16xf32>
    %c0_23 = arith.constant 0 : index
    %c0_24 = arith.constant 0 : index
    %c128 = arith.constant 128 : index
    %44 = vector.load %arg4[%c0_23, %c0_24, %c128] : memref<1x8x256xf32, #tpu.memory_space<vmem>>, vector<1x8x16xf32>
    %45 = vector.shape_cast %44 : vector<1x8x16xf32> to vector<8x16xf32>
    %46 = vector.shape_cast %43 : vector<8x16xf32> to vector<1x8x16xf32>
    tpu.vector_store %arg4[%c0_23, %c0_24, %c128], %46 {strides = array<i32>} : memref<1x8x256xf32, #tpu.memory_space<vmem>>, vector<1x8x16xf32>,
    %47 = vector.extract_strided_slice %10 {offsets = [0, 162], sizes = [8, 16], strides = [1, 1]} : vector<8x288xf32> to vector<8x16xf32>
    %c0_25 = arith.constant 0 : index
    %c0_26 = arith.constant 0 : index
    %c144 = arith.constant 144 : index
    %48 = vector.load %arg4[%c0_25, %c0_26, %c144] : memref<1x8x256xf32, #tpu.memory_space<vmem>>, vector<1x8x16xf32>
    %49 = vector.shape_cast %48 : vector<1x8x16xf32> to vector<8x16xf32>
    %50 = vector.shape_cast %47 : vector<8x16xf32> to vector<1x8x16xf32>
    tpu.vector_store %arg4[%c0_25, %c0_26, %c144], %50 {strides = array<i32>} : memref<1x8x256xf32, #tpu.memory_space<vmem>>, vector<1x8x16xf32>,
    %51 = vector.extract_strided_slice %10 {offsets = [0, 180], sizes = [8, 16], strides = [1, 1]} : vector<8x288xf32> to vector<8x16xf32>
    %c0_27 = arith.constant 0 : index
    %c0_28 = arith.constant 0 : index
    %c160 = arith.constant 160 : index
    %52 = vector.load %arg4[%c0_27, %c0_28, %c160] : memref<1x8x256xf32, #tpu.memory_space<vmem>>, vector<1x8x16xf32>
    %53 = vector.shape_cast %52 : vector<1x8x16xf32> to vector<8x16xf32>
    %54 = vector.shape_cast %51 : vector<8x16xf32> to vector<1x8x16xf32>
    tpu.vector_store %arg4[%c0_27, %c0_28, %c160], %54 {strides = array<i32>} : memref<1x8x256xf32, #tpu.memory_space<vmem>>, vector<1x8x16xf32>,
    %55 = vector.extract_strided_slice %10 {offsets = [0, 198], sizes = [8, 16], strides = [1, 1]} : vector<8x288xf32> to vector<8x16xf32>
    %c0_29 = arith.constant 0 : index
    %c0_30 = arith.constant 0 : index
    %c176 = arith.constant 176 : index
    %56 = vector.load %arg4[%c0_29, %c0_30, %c176] : memref<1x8x256xf32, #tpu.memory_space<vmem>>, vector<1x8x16xf32>
    %57 = vector.shape_cast %56 : vector<1x8x16xf32> to vector<8x16xf32>
    %58 = vector.shape_cast %55 : vector<8x16xf32> to vector<1x8x16xf32>
    tpu.vector_store %arg4[%c0_29, %c0_30, %c176], %58 {strides = array<i32>} : memref<1x8x256xf32, #tpu.memory_space<vmem>>, vector<1x8x16xf32>,
    %59 = vector.extract_strided_slice %10 {offsets = [0, 216], sizes = [8, 16], strides = [1, 1]} : vector<8x288xf32> to vector<8x16xf32>
    %c0_31 = arith.constant 0 : index
    %c0_32 = arith.constant 0 : index
    %c192 = arith.constant 192 : index
    %60 = vector.load %arg4[%c0_31, %c0_32, %c192] : memref<1x8x256xf32, #tpu.memory_space<vmem>>, vector<1x8x16xf32>
    %61 = vector.shape_cast %60 : vector<1x8x16xf32> to vector<8x16xf32>
    %62 = vector.shape_cast %59 : vector<8x16xf32> to vector<1x8x16xf32>
    tpu.vector_store %arg4[%c0_31, %c0_32, %c192], %62 {strides = array<i32>} : memref<1x8x256xf32, #tpu.memory_space<vmem>>, vector<1x8x16xf32>,
    %63 = vector.extract_strided_slice %10 {offsets = [0, 234], sizes = [8, 16], strides = [1, 1]} : vector<8x288xf32> to vector<8x16xf32>
    %c0_33 = arith.constant 0 : index
    %c0_34 = arith.constant 0 : index
    %c208 = arith.constant 208 : index
    %64 = vector.load %arg4[%c0_33, %c0_34, %c208] : memref<1x8x256xf32, #tpu.memory_space<vmem>>, vector<1x8x16xf32>
    %65 = vector.shape_cast %64 : vector<1x8x16xf32> to vector<8x16xf32>
    %66 = vector.shape_cast %63 : vector<8x16xf32> to vector<1x8x16xf32>
    tpu.vector_store %arg4[%c0_33, %c0_34, %c208], %66 {strides = array<i32>} : memref<1x8x256xf32, #tpu.memory_space<vmem>>, vector<1x8x16xf32>,
    %67 = vector.extract_strided_slice %10 {offsets = [0, 252], sizes = [8, 16], strides = [1, 1]} : vector<8x288xf32> to vector<8x16xf32>
    %c0_35 = arith.constant 0 : index
    %c0_36 = arith.constant 0 : index
    %c224 = arith.constant 224 : index
    %68 = vector.load %arg4[%c0_35, %c0_36, %c224] : memref<1x8x256xf32, #tpu.memory_space<vmem>>, vector<1x8x16xf32>
    %69 = vector.shape_cast %68 : vector<1x8x16xf32> to vector<8x16xf32>
    %70 = vector.shape_cast %67 : vector<8x16xf32> to vector<1x8x16xf32>
    tpu.vector_store %arg4[%c0_35, %c0_36, %c224], %70 {strides = array<i32>} : memref<1x8x256xf32, #tpu.memory_space<vmem>>, vector<1x8x16xf32>,
    %71 = vector.extract_strided_slice %10 {offsets = [0, 270], sizes = [8, 16], strides = [1, 1]} : vector<8x288xf32> to vector<8x16xf32>
    %c0_37 = arith.constant 0 : index
    %c0_38 = arith.constant 0 : index
    %c240 = arith.constant 240 : index
    %72 = vector.load %arg4[%c0_37, %c0_38, %c240] : memref<1x8x256xf32, #tpu.memory_space<vmem>>, vector<1x8x16xf32>
    %73 = vector.shape_cast %72 : vector<1x8x16xf32> to vector<8x16xf32>
    %74 = vector.shape_cast %71 : vector<8x16xf32> to vector<1x8x16xf32>
    tpu.vector_store %arg4[%c0_37, %c0_38, %c240], %74 {strides = array<i32>} : memref<1x8x256xf32, #tpu.memory_space<vmem>>, vector<1x8x16xf32>,
    return
  }
  func.func @transform_0(%arg0: i32) -> (i32, i32, i32) {
    %c0_i32 = arith.constant 0 : i32
    %c0_i32_0 = arith.constant 0 : i32
    %c0_i32_1 = arith.constant 0 : i32
    return %arg0, %c0_i32, %c0_i32_0 : i32, i32, i32
  }
  func.func @transform_1(%arg0: i32) -> (i32, i32) {
    %c0_i32 = arith.constant 0 : i32
    %c0_i32_0 = arith.constant 0 : i32
    %c0_i32_1 = arith.constant 0 : i32
    return %c0_i32, %c0_i32_0 : i32, i32
  }
  func.func @transform_2(%arg0: i32) -> (i32, i32) {
    %c0_i32 = arith.constant 0 : i32
    %c0_i32_0 = arith.constant 0 : i32
    %c0_i32_1 = arith.constant 0 : i32
    return %c0_i32, %c0_i32_0 : i32, i32
  }
  func.func @transform_3(%arg0: i32) -> (i32, i32, i32) {
    %c0_i32 = arith.constant 0 : i32
    %c0_i32_0 = arith.constant 0 : i32
    %c0_i32_1 = arith.constant 0 : i32
    return %arg0, %c0_i32, %c0_i32_0 : i32, i32, i32
  }
}

module attributes {stable_mosaic.version = 11 : i64} {
  func.func @_fused_up_conv_kernel(%arg0: i32, %arg1: memref<1x8x128xbf16, #tpu.memory_space<vmem>>, %arg2: memref<1x8x256xf32, #tpu.memory_space<vmem>>, %arg3: memref<32x8xbf16, #tpu.memory_space<vmem>>, %arg4: memref<32x1xf32, #tpu.memory_space<vmem>>, %arg5: memref<8x72xbf16, #tpu.memory_space<vmem>>, %arg6: memref<8x1xf32, #tpu.memory_space<vmem>>, %arg7: memref<1x8x288xbf16, #tpu.memory_space<vmem>>, %arg8: memref<1x8x2xf32, #tpu.memory_space<vmem>>, %arg9: memref<8x342xbf16, #tpu.memory_space<vmem>>, %arg10: memref<72x288xbf16, #tpu.memory_space<vmem>>) attributes {dimension_semantics = [#tpu.dimension_semantics<parallel>], iteration_bounds = array<i64: 2>, scalar_prefetch = 0 : i64, scratch_operands = 2 : i64, tpu.core_type = #tpu.core_type<tc>, window_params = [{transform_indices = @transform_0, window_bounds = array<i64: 1, 8, 128>}, {transform_indices = @transform_1, window_bounds = array<i64: 1, 8, 256>}, {pipeline_mode = #tpu.pipeline_mode<synchronous>, transform_indices = @transform_2, window_bounds = array<i64: 32, 8>}, {pipeline_mode = #tpu.pipeline_mode<synchronous>, transform_indices = @transform_3, window_bounds = array<i64: 32, 1>}, {pipeline_mode = #tpu.pipeline_mode<synchronous>, transform_indices = @transform_4, window_bounds = array<i64: 8, 72>}, {pipeline_mode = #tpu.pipeline_mode<synchronous>, transform_indices = @transform_5, window_bounds = array<i64: 8, 1>}, {transform_indices = @transform_6, window_bounds = array<i64: 1, 8, 288>}, {transform_indices = @transform_7, window_bounds = array<i64: 1, 8, 2>}]} {
    %cst = arith.constant 0.000000e+00 : bf16
    %0 = vector.broadcast %cst : bf16 to vector<8x342xbf16>
    %c0 = arith.constant 0 : index
    %c0_0 = arith.constant 0 : index
    %1 = vector.load %arg9[%c0, %c0_0] : memref<8x342xbf16, #tpu.memory_space<vmem>>, vector<8x342xbf16>
    tpu.vector_store %arg9[%c0, %c0_0], %0 {strides = array<i32>} : memref<8x342xbf16, #tpu.memory_space<vmem>>, vector<8x342xbf16>,
    %c0_1 = arith.constant 0 : index
    %c0_2 = arith.constant 0 : index
    %c0_3 = arith.constant 0 : index
    %2 = vector.load %arg2[%c0_1, %c0_2, %c0_3] : memref<1x8x256xf32, #tpu.memory_space<vmem>>, vector<1x8x16xf32>
    %3 = vector.shape_cast %2 : vector<1x8x16xf32> to vector<8x16xf32>
    %4 = arith.truncf %3 : vector<8x16xf32> to vector<8x16xbf16>
    %c0_4 = arith.constant 0 : index
    %c19 = arith.constant 19 : index
    %5 = vector.load %arg9[%c0_4, %c19] : memref<8x342xbf16, #tpu.memory_space<vmem>>, vector<8x16xbf16>
    tpu.vector_store %arg9[%c0_4, %c19], %4 {strides = array<i32>} : memref<8x342xbf16, #tpu.memory_space<vmem>>, vector<8x16xbf16>,
    %c0_5 = arith.constant 0 : index
    %c0_6 = arith.constant 0 : index
    %c16 = arith.constant 16 : index
    %6 = vector.load %arg2[%c0_5, %c0_6, %c16] : memref<1x8x256xf32, #tpu.memory_space<vmem>>, vector<1x8x16xf32>
    %7 = vector.shape_cast %6 : vector<1x8x16xf32> to vector<8x16xf32>
    %8 = arith.truncf %7 : vector<8x16xf32> to vector<8x16xbf16>
    %c0_7 = arith.constant 0 : index
    %c37 = arith.constant 37 : index
    %9 = vector.load %arg9[%c0_7, %c37] : memref<8x342xbf16, #tpu.memory_space<vmem>>, vector<8x16xbf16>
    tpu.vector_store %arg9[%c0_7, %c37], %8 {strides = array<i32>} : memref<8x342xbf16, #tpu.memory_space<vmem>>, vector<8x16xbf16>,
    %c0_8 = arith.constant 0 : index
    %c0_9 = arith.constant 0 : index
    %c32 = arith.constant 32 : index
    %10 = vector.load %arg2[%c0_8, %c0_9, %c32] : memref<1x8x256xf32, #tpu.memory_space<vmem>>, vector<1x8x16xf32>
    %11 = vector.shape_cast %10 : vector<1x8x16xf32> to vector<8x16xf32>
    %12 = arith.truncf %11 : vector<8x16xf32> to vector<8x16xbf16>
    %c0_10 = arith.constant 0 : index
    %c55 = arith.constant 55 : index
    %13 = vector.load %arg9[%c0_10, %c55] : memref<8x342xbf16, #tpu.memory_space<vmem>>, vector<8x16xbf16>
    tpu.vector_store %arg9[%c0_10, %c55], %12 {strides = array<i32>} : memref<8x342xbf16, #tpu.memory_space<vmem>>, vector<8x16xbf16>,
    %c0_11 = arith.constant 0 : index
    %c0_12 = arith.constant 0 : index
    %c48 = arith.constant 48 : index
    %14 = vector.load %arg2[%c0_11, %c0_12, %c48] : memref<1x8x256xf32, #tpu.memory_space<vmem>>, vector<1x8x16xf32>
    %15 = vector.shape_cast %14 : vector<1x8x16xf32> to vector<8x16xf32>
    %16 = arith.truncf %15 : vector<8x16xf32> to vector<8x16xbf16>
    %c0_13 = arith.constant 0 : index
    %c73 = arith.constant 73 : index
    %17 = vector.load %arg9[%c0_13, %c73] : memref<8x342xbf16, #tpu.memory_space<vmem>>, vector<8x16xbf16>
    tpu.vector_store %arg9[%c0_13, %c73], %16 {strides = array<i32>} : memref<8x342xbf16, #tpu.memory_space<vmem>>, vector<8x16xbf16>,
    %c0_14 = arith.constant 0 : index
    %c0_15 = arith.constant 0 : index
    %c64 = arith.constant 64 : index
    %18 = vector.load %arg2[%c0_14, %c0_15, %c64] : memref<1x8x256xf32, #tpu.memory_space<vmem>>, vector<1x8x16xf32>
    %19 = vector.shape_cast %18 : vector<1x8x16xf32> to vector<8x16xf32>
    %20 = arith.truncf %19 : vector<8x16xf32> to vector<8x16xbf16>
    %c0_16 = arith.constant 0 : index
    %c91 = arith.constant 91 : index
    %21 = vector.load %arg9[%c0_16, %c91] : memref<8x342xbf16, #tpu.memory_space<vmem>>, vector<8x16xbf16>
    tpu.vector_store %arg9[%c0_16, %c91], %20 {strides = array<i32>} : memref<8x342xbf16, #tpu.memory_space<vmem>>, vector<8x16xbf16>,
    %c0_17 = arith.constant 0 : index
    %c0_18 = arith.constant 0 : index
    %c80 = arith.constant 80 : index
    %22 = vector.load %arg2[%c0_17, %c0_18, %c80] : memref<1x8x256xf32, #tpu.memory_space<vmem>>, vector<1x8x16xf32>
    %23 = vector.shape_cast %22 : vector<1x8x16xf32> to vector<8x16xf32>
    %24 = arith.truncf %23 : vector<8x16xf32> to vector<8x16xbf16>
    %c0_19 = arith.constant 0 : index
    %c109 = arith.constant 109 : index
    %25 = vector.load %arg9[%c0_19, %c109] : memref<8x342xbf16, #tpu.memory_space<vmem>>, vector<8x16xbf16>
    tpu.vector_store %arg9[%c0_19, %c109], %24 {strides = array<i32>} : memref<8x342xbf16, #tpu.memory_space<vmem>>, vector<8x16xbf16>,
    %c0_20 = arith.constant 0 : index
    %c0_21 = arith.constant 0 : index
    %c96 = arith.constant 96 : index
    %26 = vector.load %arg2[%c0_20, %c0_21, %c96] : memref<1x8x256xf32, #tpu.memory_space<vmem>>, vector<1x8x16xf32>
    %27 = vector.shape_cast %26 : vector<1x8x16xf32> to vector<8x16xf32>
    %28 = arith.truncf %27 : vector<8x16xf32> to vector<8x16xbf16>
    %c0_22 = arith.constant 0 : index
    %c127 = arith.constant 127 : index
    %29 = vector.load %arg9[%c0_22, %c127] : memref<8x342xbf16, #tpu.memory_space<vmem>>, vector<8x16xbf16>
    tpu.vector_store %arg9[%c0_22, %c127], %28 {strides = array<i32>} : memref<8x342xbf16, #tpu.memory_space<vmem>>, vector<8x16xbf16>,
    %c0_23 = arith.constant 0 : index
    %c0_24 = arith.constant 0 : index
    %c112 = arith.constant 112 : index
    %30 = vector.load %arg2[%c0_23, %c0_24, %c112] : memref<1x8x256xf32, #tpu.memory_space<vmem>>, vector<1x8x16xf32>
    %31 = vector.shape_cast %30 : vector<1x8x16xf32> to vector<8x16xf32>
    %32 = arith.truncf %31 : vector<8x16xf32> to vector<8x16xbf16>
    %c0_25 = arith.constant 0 : index
    %c145 = arith.constant 145 : index
    %33 = vector.load %arg9[%c0_25, %c145] : memref<8x342xbf16, #tpu.memory_space<vmem>>, vector<8x16xbf16>
    tpu.vector_store %arg9[%c0_25, %c145], %32 {strides = array<i32>} : memref<8x342xbf16, #tpu.memory_space<vmem>>, vector<8x16xbf16>,
    %c0_26 = arith.constant 0 : index
    %c0_27 = arith.constant 0 : index
    %c128 = arith.constant 128 : index
    %34 = vector.load %arg2[%c0_26, %c0_27, %c128] : memref<1x8x256xf32, #tpu.memory_space<vmem>>, vector<1x8x16xf32>
    %35 = vector.shape_cast %34 : vector<1x8x16xf32> to vector<8x16xf32>
    %36 = arith.truncf %35 : vector<8x16xf32> to vector<8x16xbf16>
    %c0_28 = arith.constant 0 : index
    %c163 = arith.constant 163 : index
    %37 = vector.load %arg9[%c0_28, %c163] : memref<8x342xbf16, #tpu.memory_space<vmem>>, vector<8x16xbf16>
    tpu.vector_store %arg9[%c0_28, %c163], %36 {strides = array<i32>} : memref<8x342xbf16, #tpu.memory_space<vmem>>, vector<8x16xbf16>,
    %c0_29 = arith.constant 0 : index
    %c0_30 = arith.constant 0 : index
    %c144 = arith.constant 144 : index
    %38 = vector.load %arg2[%c0_29, %c0_30, %c144] : memref<1x8x256xf32, #tpu.memory_space<vmem>>, vector<1x8x16xf32>
    %39 = vector.shape_cast %38 : vector<1x8x16xf32> to vector<8x16xf32>
    %40 = arith.truncf %39 : vector<8x16xf32> to vector<8x16xbf16>
    %c0_31 = arith.constant 0 : index
    %c181 = arith.constant 181 : index
    %41 = vector.load %arg9[%c0_31, %c181] : memref<8x342xbf16, #tpu.memory_space<vmem>>, vector<8x16xbf16>
    tpu.vector_store %arg9[%c0_31, %c181], %40 {strides = array<i32>} : memref<8x342xbf16, #tpu.memory_space<vmem>>, vector<8x16xbf16>,
    %c0_32 = arith.constant 0 : index
    %c0_33 = arith.constant 0 : index
    %c160 = arith.constant 160 : index
    %42 = vector.load %arg2[%c0_32, %c0_33, %c160] : memref<1x8x256xf32, #tpu.memory_space<vmem>>, vector<1x8x16xf32>
    %43 = vector.shape_cast %42 : vector<1x8x16xf32> to vector<8x16xf32>
    %44 = arith.truncf %43 : vector<8x16xf32> to vector<8x16xbf16>
    %c0_34 = arith.constant 0 : index
    %c199 = arith.constant 199 : index
    %45 = vector.load %arg9[%c0_34, %c199] : memref<8x342xbf16, #tpu.memory_space<vmem>>, vector<8x16xbf16>
    tpu.vector_store %arg9[%c0_34, %c199], %44 {strides = array<i32>} : memref<8x342xbf16, #tpu.memory_space<vmem>>, vector<8x16xbf16>,
    %c0_35 = arith.constant 0 : index
    %c0_36 = arith.constant 0 : index
    %c176 = arith.constant 176 : index
    %46 = vector.load %arg2[%c0_35, %c0_36, %c176] : memref<1x8x256xf32, #tpu.memory_space<vmem>>, vector<1x8x16xf32>
    %47 = vector.shape_cast %46 : vector<1x8x16xf32> to vector<8x16xf32>
    %48 = arith.truncf %47 : vector<8x16xf32> to vector<8x16xbf16>
    %c0_37 = arith.constant 0 : index
    %c217 = arith.constant 217 : index
    %49 = vector.load %arg9[%c0_37, %c217] : memref<8x342xbf16, #tpu.memory_space<vmem>>, vector<8x16xbf16>
    tpu.vector_store %arg9[%c0_37, %c217], %48 {strides = array<i32>} : memref<8x342xbf16, #tpu.memory_space<vmem>>, vector<8x16xbf16>,
    %c0_38 = arith.constant 0 : index
    %c0_39 = arith.constant 0 : index
    %c192 = arith.constant 192 : index
    %50 = vector.load %arg2[%c0_38, %c0_39, %c192] : memref<1x8x256xf32, #tpu.memory_space<vmem>>, vector<1x8x16xf32>
    %51 = vector.shape_cast %50 : vector<1x8x16xf32> to vector<8x16xf32>
    %52 = arith.truncf %51 : vector<8x16xf32> to vector<8x16xbf16>
    %c0_40 = arith.constant 0 : index
    %c235 = arith.constant 235 : index
    %53 = vector.load %arg9[%c0_40, %c235] : memref<8x342xbf16, #tpu.memory_space<vmem>>, vector<8x16xbf16>
    tpu.vector_store %arg9[%c0_40, %c235], %52 {strides = array<i32>} : memref<8x342xbf16, #tpu.memory_space<vmem>>, vector<8x16xbf16>,
    %c0_41 = arith.constant 0 : index
    %c0_42 = arith.constant 0 : index
    %c208 = arith.constant 208 : index
    %54 = vector.load %arg2[%c0_41, %c0_42, %c208] : memref<1x8x256xf32, #tpu.memory_space<vmem>>, vector<1x8x16xf32>
    %55 = vector.shape_cast %54 : vector<1x8x16xf32> to vector<8x16xf32>
    %56 = arith.truncf %55 : vector<8x16xf32> to vector<8x16xbf16>
    %c0_43 = arith.constant 0 : index
    %c253 = arith.constant 253 : index
    %57 = vector.load %arg9[%c0_43, %c253] : memref<8x342xbf16, #tpu.memory_space<vmem>>, vector<8x16xbf16>
    tpu.vector_store %arg9[%c0_43, %c253], %56 {strides = array<i32>} : memref<8x342xbf16, #tpu.memory_space<vmem>>, vector<8x16xbf16>,
    %c0_44 = arith.constant 0 : index
    %c0_45 = arith.constant 0 : index
    %c224 = arith.constant 224 : index
    %58 = vector.load %arg2[%c0_44, %c0_45, %c224] : memref<1x8x256xf32, #tpu.memory_space<vmem>>, vector<1x8x16xf32>
    %59 = vector.shape_cast %58 : vector<1x8x16xf32> to vector<8x16xf32>
    %60 = arith.truncf %59 : vector<8x16xf32> to vector<8x16xbf16>
    %c0_46 = arith.constant 0 : index
    %c271 = arith.constant 271 : index
    %61 = vector.load %arg9[%c0_46, %c271] : memref<8x342xbf16, #tpu.memory_space<vmem>>, vector<8x16xbf16>
    tpu.vector_store %arg9[%c0_46, %c271], %60 {strides = array<i32>} : memref<8x342xbf16, #tpu.memory_space<vmem>>, vector<8x16xbf16>,
    %c0_47 = arith.constant 0 : index
    %c0_48 = arith.constant 0 : index
    %c240 = arith.constant 240 : index
    %62 = vector.load %arg2[%c0_47, %c0_48, %c240] : memref<1x8x256xf32, #tpu.memory_space<vmem>>, vector<1x8x16xf32>
    %63 = vector.shape_cast %62 : vector<1x8x16xf32> to vector<8x16xf32>
    %64 = arith.truncf %63 : vector<8x16xf32> to vector<8x16xbf16>
    %c0_49 = arith.constant 0 : index
    %c289 = arith.constant 289 : index
    %65 = vector.load %arg9[%c0_49, %c289] : memref<8x342xbf16, #tpu.memory_space<vmem>>, vector<8x16xbf16>
    tpu.vector_store %arg9[%c0_49, %c289], %64 {strides = array<i32>} : memref<8x342xbf16, #tpu.memory_space<vmem>>, vector<8x16xbf16>,
    %c0_50 = arith.constant 0 : index
    %c0_51 = arith.constant 0 : index
    %66 = vector.load %arg3[%c0_50, %c0_51] : memref<32x8xbf16, #tpu.memory_space<vmem>>, vector<32x8xbf16>
    %c0_52 = arith.constant 0 : index
    %c0_53 = arith.constant 0 : index
    %c0_54 = arith.constant 0 : index
    %67 = vector.load %arg1[%c0_52, %c0_53, %c0_54] : memref<1x8x128xbf16, #tpu.memory_space<vmem>>, vector<1x8x128xbf16>
    %68 = vector.shape_cast %67 : vector<1x8x128xbf16> to vector<8x128xbf16>
    %cst_55 = arith.constant dense<0.000000e+00> : vector<32x128xf32>
    %69 = tpu.matmul %66, %68, %cst_55 {dimension_numbers = #tpu.dot_dimension_numbers<[1], [0], [0], [1], [0, 0, 1, 1], [], []>} : vector<32x8xbf16>, vector<8x128xbf16>, vector<32x128xf32> -> vector<32x128xf32>
    %c0_56 = arith.constant 0 : index
    %c0_57 = arith.constant 0 : index
    %70 = vector.load %arg4[%c0_56, %c0_57] : memref<32x1xf32, #tpu.memory_space<vmem>>, vector<32x1xf32>
    %71 = vector.broadcast %70 : vector<32x1xf32> to vector<32x128xf32>
    %72 = arith.addf %69, %71 : vector<32x128xf32>
    %73 = tpu.iota {dimensions = array<i32: 1>} : vector<1x128xi32>
    %c2_i32 = arith.constant 2 : i32
    %c0_i32 = arith.constant 0 : i32
    %74 = arith.cmpi eq, %c2_i32, %c0_i32 : i32
    %c1_i32 = arith.constant 1 : i32
    %75 = arith.select %74, %c1_i32, %c2_i32 : i32
    %76 = vector.broadcast %75 : i32 to vector<1x128xi32>
    %77 = arith.remsi %73, %76 : vector<1x128xi32>
    %c0_i32_58 = arith.constant 0 : i32
    %78 = vector.broadcast %c0_i32_58 : i32 to vector<1x128xi32>
    %79 = arith.cmpi ne, %77, %78 : vector<1x128xi32>
    %c0_i32_59 = arith.constant 0 : i32
    %80 = vector.broadcast %c0_i32_59 : i32 to vector<1x128xi32>
    %81 = arith.cmpi slt, %77, %80 : vector<1x128xi32>
    %c0_i32_60 = arith.constant 0 : i32
    %82 = arith.cmpi slt, %75, %c0_i32_60 : i32
    %83 = vector.broadcast %82 : i1 to vector<1x128xi1>
    %84 = vector.broadcast %83 : vector<1x128xi1> to vector<1x128xi1>
    %85 = arith.xori %81, %84 : vector<1x128xi1>
    %86 = arith.andi %85, %79 : vector<1x128xi1>
    %87 = vector.broadcast %75 : i32 to vector<1x128xi32>
    %88 = arith.addi %77, %87 : vector<1x128xi32>
    %89 = arith.select %86, %88, %77 : vector<1x128xi1>, vector<1x128xi32>
    %c0_i32_61 = arith.constant 0 : i32
    %90 = vector.broadcast %c0_i32_61 : i32 to vector<1x128xi32>
    %91 = arith.cmpi eq, %89, %90 : vector<1x128xi32>
    %92 = vector.extract_strided_slice %72 {offsets = [0, 0], sizes = [8, 128], strides = [1, 1]} : vector<32x128xf32> to vector<8x128xf32>
    %93 = vector.extract_strided_slice %72 {offsets = [8, 0], sizes = [8, 128], strides = [1, 1]} : vector<32x128xf32> to vector<8x128xf32>
    %94 = vector.shape_cast %91 : vector<1x128xi1> to vector<1x128xi1>
    %95 = vector.broadcast %94 : vector<1x128xi1> to vector<8x128xi1>
    %96 = arith.select %95, %92, %93 : vector<8x128xi1>, vector<8x128xf32>
    %c0_62 = arith.constant 0 : index
    %c19_63 = arith.constant 19 : index
    %97 = vector.load %arg9[%c0_62, %c19_63] : memref<8x342xbf16, #tpu.memory_space<vmem>>, vector<8x16xbf16>
    %98 = arith.extf %97 : vector<8x16xbf16> to vector<8x16xf32>
    %99 = vector.extract_strided_slice %96 {offsets = [0, 0], sizes = [8, 16], strides = [1, 1]} : vector<8x128xf32> to vector<8x16xf32>
    %100 = arith.addf %98, %99 : vector<8x16xf32>
    %101 = arith.truncf %100 : vector<8x16xf32> to vector<8x16xbf16>
    %c0_64 = arith.constant 0 : index
    %c19_65 = arith.constant 19 : index
    %102 = vector.load %arg9[%c0_64, %c19_65] : memref<8x342xbf16, #tpu.memory_space<vmem>>, vector<8x16xbf16>
    tpu.vector_store %arg9[%c0_64, %c19_65], %101 {strides = array<i32>} : memref<8x342xbf16, #tpu.memory_space<vmem>>, vector<8x16xbf16>,
    %c0_66 = arith.constant 0 : index
    %c55_67 = arith.constant 55 : index
    %103 = vector.load %arg9[%c0_66, %c55_67] : memref<8x342xbf16, #tpu.memory_space<vmem>>, vector<8x16xbf16>
    %104 = arith.extf %103 : vector<8x16xbf16> to vector<8x16xf32>
    %105 = vector.extract_strided_slice %96 {offsets = [0, 16], sizes = [8, 16], strides = [1, 1]} : vector<8x128xf32> to vector<8x16xf32>
    %106 = arith.addf %104, %105 : vector<8x16xf32>
    %107 = arith.truncf %106 : vector<8x16xf32> to vector<8x16xbf16>
    %c0_68 = arith.constant 0 : index
    %c55_69 = arith.constant 55 : index
    %108 = vector.load %arg9[%c0_68, %c55_69] : memref<8x342xbf16, #tpu.memory_space<vmem>>, vector<8x16xbf16>
    tpu.vector_store %arg9[%c0_68, %c55_69], %107 {strides = array<i32>} : memref<8x342xbf16, #tpu.memory_space<vmem>>, vector<8x16xbf16>,
    %c0_70 = arith.constant 0 : index
    %c91_71 = arith.constant 91 : index
    %109 = vector.load %arg9[%c0_70, %c91_71] : memref<8x342xbf16, #tpu.memory_space<vmem>>, vector<8x16xbf16>
    %110 = arith.extf %109 : vector<8x16xbf16> to vector<8x16xf32>
    %111 = vector.extract_strided_slice %96 {offsets = [0, 32], sizes = [8, 16], strides = [1, 1]} : vector<8x128xf32> to vector<8x16xf32>
    %112 = arith.addf %110, %111 : vector<8x16xf32>
    %113 = arith.truncf %112 : vector<8x16xf32> to vector<8x16xbf16>
    %c0_72 = arith.constant 0 : index
    %c91_73 = arith.constant 91 : index
    %114 = vector.load %arg9[%c0_72, %c91_73] : memref<8x342xbf16, #tpu.memory_space<vmem>>, vector<8x16xbf16>
    tpu.vector_store %arg9[%c0_72, %c91_73], %113 {strides = array<i32>} : memref<8x342xbf16, #tpu.memory_space<vmem>>, vector<8x16xbf16>,
    %c0_74 = arith.constant 0 : index
    %c127_75 = arith.constant 127 : index
    %115 = vector.load %arg9[%c0_74, %c127_75] : memref<8x342xbf16, #tpu.memory_space<vmem>>, vector<8x16xbf16>
    %116 = arith.extf %115 : vector<8x16xbf16> to vector<8x16xf32>
    %117 = vector.extract_strided_slice %96 {offsets = [0, 48], sizes = [8, 16], strides = [1, 1]} : vector<8x128xf32> to vector<8x16xf32>
    %118 = arith.addf %116, %117 : vector<8x16xf32>
    %119 = arith.truncf %118 : vector<8x16xf32> to vector<8x16xbf16>
    %c0_76 = arith.constant 0 : index
    %c127_77 = arith.constant 127 : index
    %120 = vector.load %arg9[%c0_76, %c127_77] : memref<8x342xbf16, #tpu.memory_space<vmem>>, vector<8x16xbf16>
    tpu.vector_store %arg9[%c0_76, %c127_77], %119 {strides = array<i32>} : memref<8x342xbf16, #tpu.memory_space<vmem>>, vector<8x16xbf16>,
    %c0_78 = arith.constant 0 : index
    %c163_79 = arith.constant 163 : index
    %121 = vector.load %arg9[%c0_78, %c163_79] : memref<8x342xbf16, #tpu.memory_space<vmem>>, vector<8x16xbf16>
    %122 = arith.extf %121 : vector<8x16xbf16> to vector<8x16xf32>
    %123 = vector.extract_strided_slice %96 {offsets = [0, 64], sizes = [8, 16], strides = [1, 1]} : vector<8x128xf32> to vector<8x16xf32>
    %124 = arith.addf %122, %123 : vector<8x16xf32>
    %125 = arith.truncf %124 : vector<8x16xf32> to vector<8x16xbf16>
    %c0_80 = arith.constant 0 : index
    %c163_81 = arith.constant 163 : index
    %126 = vector.load %arg9[%c0_80, %c163_81] : memref<8x342xbf16, #tpu.memory_space<vmem>>, vector<8x16xbf16>
    tpu.vector_store %arg9[%c0_80, %c163_81], %125 {strides = array<i32>} : memref<8x342xbf16, #tpu.memory_space<vmem>>, vector<8x16xbf16>,
    %c0_82 = arith.constant 0 : index
    %c199_83 = arith.constant 199 : index
    %127 = vector.load %arg9[%c0_82, %c199_83] : memref<8x342xbf16, #tpu.memory_space<vmem>>, vector<8x16xbf16>
    %128 = arith.extf %127 : vector<8x16xbf16> to vector<8x16xf32>
    %129 = vector.extract_strided_slice %96 {offsets = [0, 80], sizes = [8, 16], strides = [1, 1]} : vector<8x128xf32> to vector<8x16xf32>
    %130 = arith.addf %128, %129 : vector<8x16xf32>
    %131 = arith.truncf %130 : vector<8x16xf32> to vector<8x16xbf16>
    %c0_84 = arith.constant 0 : index
    %c199_85 = arith.constant 199 : index
    %132 = vector.load %arg9[%c0_84, %c199_85] : memref<8x342xbf16, #tpu.memory_space<vmem>>, vector<8x16xbf16>
    tpu.vector_store %arg9[%c0_84, %c199_85], %131 {strides = array<i32>} : memref<8x342xbf16, #tpu.memory_space<vmem>>, vector<8x16xbf16>,
    %c0_86 = arith.constant 0 : index
    %c235_87 = arith.constant 235 : index
    %133 = vector.load %arg9[%c0_86, %c235_87] : memref<8x342xbf16, #tpu.memory_space<vmem>>, vector<8x16xbf16>
    %134 = arith.extf %133 : vector<8x16xbf16> to vector<8x16xf32>
    %135 = vector.extract_strided_slice %96 {offsets = [0, 96], sizes = [8, 16], strides = [1, 1]} : vector<8x128xf32> to vector<8x16xf32>
    %136 = arith.addf %134, %135 : vector<8x16xf32>
    %137 = arith.truncf %136 : vector<8x16xf32> to vector<8x16xbf16>
    %c0_88 = arith.constant 0 : index
    %c235_89 = arith.constant 235 : index
    %138 = vector.load %arg9[%c0_88, %c235_89] : memref<8x342xbf16, #tpu.memory_space<vmem>>, vector<8x16xbf16>
    tpu.vector_store %arg9[%c0_88, %c235_89], %137 {strides = array<i32>} : memref<8x342xbf16, #tpu.memory_space<vmem>>, vector<8x16xbf16>,
    %c0_90 = arith.constant 0 : index
    %c271_91 = arith.constant 271 : index
    %139 = vector.load %arg9[%c0_90, %c271_91] : memref<8x342xbf16, #tpu.memory_space<vmem>>, vector<8x16xbf16>
    %140 = arith.extf %139 : vector<8x16xbf16> to vector<8x16xf32>
    %141 = vector.extract_strided_slice %96 {offsets = [0, 112], sizes = [8, 16], strides = [1, 1]} : vector<8x128xf32> to vector<8x16xf32>
    %142 = arith.addf %140, %141 : vector<8x16xf32>
    %143 = arith.truncf %142 : vector<8x16xf32> to vector<8x16xbf16>
    %c0_92 = arith.constant 0 : index
    %c271_93 = arith.constant 271 : index
    %144 = vector.load %arg9[%c0_92, %c271_93] : memref<8x342xbf16, #tpu.memory_space<vmem>>, vector<8x16xbf16>
    tpu.vector_store %arg9[%c0_92, %c271_93], %143 {strides = array<i32>} : memref<8x342xbf16, #tpu.memory_space<vmem>>, vector<8x16xbf16>,
    %145 = vector.extract_strided_slice %72 {offsets = [16, 0], sizes = [8, 128], strides = [1, 1]} : vector<32x128xf32> to vector<8x128xf32>
    %146 = vector.extract_strided_slice %72 {offsets = [24, 0], sizes = [8, 128], strides = [1, 1]} : vector<32x128xf32> to vector<8x128xf32>
    %147 = vector.shape_cast %91 : vector<1x128xi1> to vector<1x128xi1>
    %148 = vector.broadcast %147 : vector<1x128xi1> to vector<8x128xi1>
    %149 = arith.select %148, %145, %146 : vector<8x128xi1>, vector<8x128xf32>
    %c0_94 = arith.constant 0 : index
    %c37_95 = arith.constant 37 : index
    %150 = vector.load %arg9[%c0_94, %c37_95] : memref<8x342xbf16, #tpu.memory_space<vmem>>, vector<8x16xbf16>
    %151 = arith.extf %150 : vector<8x16xbf16> to vector<8x16xf32>
    %152 = vector.extract_strided_slice %149 {offsets = [0, 0], sizes = [8, 16], strides = [1, 1]} : vector<8x128xf32> to vector<8x16xf32>
    %153 = arith.addf %151, %152 : vector<8x16xf32>
    %154 = arith.truncf %153 : vector<8x16xf32> to vector<8x16xbf16>
    %c0_96 = arith.constant 0 : index
    %c37_97 = arith.constant 37 : index
    %155 = vector.load %arg9[%c0_96, %c37_97] : memref<8x342xbf16, #tpu.memory_space<vmem>>, vector<8x16xbf16>
    tpu.vector_store %arg9[%c0_96, %c37_97], %154 {strides = array<i32>} : memref<8x342xbf16, #tpu.memory_space<vmem>>, vector<8x16xbf16>,
    %c0_98 = arith.constant 0 : index
    %c73_99 = arith.constant 73 : index
    %156 = vector.load %arg9[%c0_98, %c73_99] : memref<8x342xbf16, #tpu.memory_space<vmem>>, vector<8x16xbf16>
    %157 = arith.extf %156 : vector<8x16xbf16> to vector<8x16xf32>
    %158 = vector.extract_strided_slice %149 {offsets = [0, 16], sizes = [8, 16], strides = [1, 1]} : vector<8x128xf32> to vector<8x16xf32>
    %159 = arith.addf %157, %158 : vector<8x16xf32>
    %160 = arith.truncf %159 : vector<8x16xf32> to vector<8x16xbf16>
    %c0_100 = arith.constant 0 : index
    %c73_101 = arith.constant 73 : index
    %161 = vector.load %arg9[%c0_100, %c73_101] : memref<8x342xbf16, #tpu.memory_space<vmem>>, vector<8x16xbf16>
    tpu.vector_store %arg9[%c0_100, %c73_101], %160 {strides = array<i32>} : memref<8x342xbf16, #tpu.memory_space<vmem>>, vector<8x16xbf16>,
    %c0_102 = arith.constant 0 : index
    %c109_103 = arith.constant 109 : index
    %162 = vector.load %arg9[%c0_102, %c109_103] : memref<8x342xbf16, #tpu.memory_space<vmem>>, vector<8x16xbf16>
    %163 = arith.extf %162 : vector<8x16xbf16> to vector<8x16xf32>
    %164 = vector.extract_strided_slice %149 {offsets = [0, 32], sizes = [8, 16], strides = [1, 1]} : vector<8x128xf32> to vector<8x16xf32>
    %165 = arith.addf %163, %164 : vector<8x16xf32>
    %166 = arith.truncf %165 : vector<8x16xf32> to vector<8x16xbf16>
    %c0_104 = arith.constant 0 : index
    %c109_105 = arith.constant 109 : index
    %167 = vector.load %arg9[%c0_104, %c109_105] : memref<8x342xbf16, #tpu.memory_space<vmem>>, vector<8x16xbf16>
    tpu.vector_store %arg9[%c0_104, %c109_105], %166 {strides = array<i32>} : memref<8x342xbf16, #tpu.memory_space<vmem>>, vector<8x16xbf16>,
    %c0_106 = arith.constant 0 : index
    %c145_107 = arith.constant 145 : index
    %168 = vector.load %arg9[%c0_106, %c145_107] : memref<8x342xbf16, #tpu.memory_space<vmem>>, vector<8x16xbf16>
    %169 = arith.extf %168 : vector<8x16xbf16> to vector<8x16xf32>
    %170 = vector.extract_strided_slice %149 {offsets = [0, 48], sizes = [8, 16], strides = [1, 1]} : vector<8x128xf32> to vector<8x16xf32>
    %171 = arith.addf %169, %170 : vector<8x16xf32>
    %172 = arith.truncf %171 : vector<8x16xf32> to vector<8x16xbf16>
    %c0_108 = arith.constant 0 : index
    %c145_109 = arith.constant 145 : index
    %173 = vector.load %arg9[%c0_108, %c145_109] : memref<8x342xbf16, #tpu.memory_space<vmem>>, vector<8x16xbf16>
    tpu.vector_store %arg9[%c0_108, %c145_109], %172 {strides = array<i32>} : memref<8x342xbf16, #tpu.memory_space<vmem>>, vector<8x16xbf16>,
    %c0_110 = arith.constant 0 : index
    %c181_111 = arith.constant 181 : index
    %174 = vector.load %arg9[%c0_110, %c181_111] : memref<8x342xbf16, #tpu.memory_space<vmem>>, vector<8x16xbf16>
    %175 = arith.extf %174 : vector<8x16xbf16> to vector<8x16xf32>
    %176 = vector.extract_strided_slice %149 {offsets = [0, 64], sizes = [8, 16], strides = [1, 1]} : vector<8x128xf32> to vector<8x16xf32>
    %177 = arith.addf %175, %176 : vector<8x16xf32>
    %178 = arith.truncf %177 : vector<8x16xf32> to vector<8x16xbf16>
    %c0_112 = arith.constant 0 : index
    %c181_113 = arith.constant 181 : index
    %179 = vector.load %arg9[%c0_112, %c181_113] : memref<8x342xbf16, #tpu.memory_space<vmem>>, vector<8x16xbf16>
    tpu.vector_store %arg9[%c0_112, %c181_113], %178 {strides = array<i32>} : memref<8x342xbf16, #tpu.memory_space<vmem>>, vector<8x16xbf16>,
    %c0_114 = arith.constant 0 : index
    %c217_115 = arith.constant 217 : index
    %180 = vector.load %arg9[%c0_114, %c217_115] : memref<8x342xbf16, #tpu.memory_space<vmem>>, vector<8x16xbf16>
    %181 = arith.extf %180 : vector<8x16xbf16> to vector<8x16xf32>
    %182 = vector.extract_strided_slice %149 {offsets = [0, 80], sizes = [8, 16], strides = [1, 1]} : vector<8x128xf32> to vector<8x16xf32>
    %183 = arith.addf %181, %182 : vector<8x16xf32>
    %184 = arith.truncf %183 : vector<8x16xf32> to vector<8x16xbf16>
    %c0_116 = arith.constant 0 : index
    %c217_117 = arith.constant 217 : index
    %185 = vector.load %arg9[%c0_116, %c217_117] : memref<8x342xbf16, #tpu.memory_space<vmem>>, vector<8x16xbf16>
    tpu.vector_store %arg9[%c0_116, %c217_117], %184 {strides = array<i32>} : memref<8x342xbf16, #tpu.memory_space<vmem>>, vector<8x16xbf16>,
    %c0_118 = arith.constant 0 : index
    %c253_119 = arith.constant 253 : index
    %186 = vector.load %arg9[%c0_118, %c253_119] : memref<8x342xbf16, #tpu.memory_space<vmem>>, vector<8x16xbf16>
    %187 = arith.extf %186 : vector<8x16xbf16> to vector<8x16xf32>
    %188 = vector.extract_strided_slice %149 {offsets = [0, 96], sizes = [8, 16], strides = [1, 1]} : vector<8x128xf32> to vector<8x16xf32>
    %189 = arith.addf %187, %188 : vector<8x16xf32>
    %190 = arith.truncf %189 : vector<8x16xf32> to vector<8x16xbf16>
    %c0_120 = arith.constant 0 : index
    %c253_121 = arith.constant 253 : index
    %191 = vector.load %arg9[%c0_120, %c253_121] : memref<8x342xbf16, #tpu.memory_space<vmem>>, vector<8x16xbf16>
    tpu.vector_store %arg9[%c0_120, %c253_121], %190 {strides = array<i32>} : memref<8x342xbf16, #tpu.memory_space<vmem>>, vector<8x16xbf16>,
    %c0_122 = arith.constant 0 : index
    %c289_123 = arith.constant 289 : index
    %192 = vector.load %arg9[%c0_122, %c289_123] : memref<8x342xbf16, #tpu.memory_space<vmem>>, vector<8x16xbf16>
    %193 = arith.extf %192 : vector<8x16xbf16> to vector<8x16xf32>
    %194 = vector.extract_strided_slice %149 {offsets = [0, 112], sizes = [8, 16], strides = [1, 1]} : vector<8x128xf32> to vector<8x16xf32>
    %195 = arith.addf %193, %194 : vector<8x16xf32>
    %196 = arith.truncf %195 : vector<8x16xf32> to vector<8x16xbf16>
    %c0_124 = arith.constant 0 : index
    %c289_125 = arith.constant 289 : index
    %197 = vector.load %arg9[%c0_124, %c289_125] : memref<8x342xbf16, #tpu.memory_space<vmem>>, vector<8x16xbf16>
    tpu.vector_store %arg9[%c0_124, %c289_125], %196 {strides = array<i32>} : memref<8x342xbf16, #tpu.memory_space<vmem>>, vector<8x16xbf16>,
    %c0_126 = arith.constant 0 : index
    %c0_127 = arith.constant 0 : index
    %198 = vector.load %arg9[%c0_126, %c0_127] : memref<8x342xbf16, #tpu.memory_space<vmem>>, vector<8x288xbf16>
    %c0_128 = arith.constant 0 : index
    %c0_129 = arith.constant 0 : index
    %199 = vector.load %arg10[%c0_128, %c0_129] : memref<72x288xbf16, #tpu.memory_space<vmem>>, vector<8x288xbf16>
    tpu.vector_store %arg10[%c0_128, %c0_129], %198 {strides = array<i32>} : memref<72x288xbf16, #tpu.memory_space<vmem>>, vector<8x288xbf16>,
    %c0_130 = arith.constant 0 : index
    %c1 = arith.constant 1 : index
    %200 = vector.load %arg9[%c0_130, %c1] : memref<8x342xbf16, #tpu.memory_space<vmem>>, vector<8x288xbf16>
    %c8 = arith.constant 8 : index
    %c0_131 = arith.constant 0 : index
    %201 = vector.load %arg10[%c8, %c0_131] : memref<72x288xbf16, #tpu.memory_space<vmem>>, vector<8x288xbf16>
    tpu.vector_store %arg10[%c8, %c0_131], %200 {strides = array<i32>} : memref<72x288xbf16, #tpu.memory_space<vmem>>, vector<8x288xbf16>,
    %c0_132 = arith.constant 0 : index
    %c2 = arith.constant 2 : index
    %202 = vector.load %arg9[%c0_132, %c2] : memref<8x342xbf16, #tpu.memory_space<vmem>>, vector<8x288xbf16>
    %c16_133 = arith.constant 16 : index
    %c0_134 = arith.constant 0 : index
    %203 = vector.load %arg10[%c16_133, %c0_134] : memref<72x288xbf16, #tpu.memory_space<vmem>>, vector<8x288xbf16>
    tpu.vector_store %arg10[%c16_133, %c0_134], %202 {strides = array<i32>} : memref<72x288xbf16, #tpu.memory_space<vmem>>, vector<8x288xbf16>,
    %c0_135 = arith.constant 0 : index
    %c18 = arith.constant 18 : index
    %204 = vector.load %arg9[%c0_135, %c18] : memref<8x342xbf16, #tpu.memory_space<vmem>>, vector<8x288xbf16>
    %c24 = arith.constant 24 : index
    %c0_136 = arith.constant 0 : index
    %205 = vector.load %arg10[%c24, %c0_136] : memref<72x288xbf16, #tpu.memory_space<vmem>>, vector<8x288xbf16>
    tpu.vector_store %arg10[%c24, %c0_136], %204 {strides = array<i32>} : memref<72x288xbf16, #tpu.memory_space<vmem>>, vector<8x288xbf16>,
    %c0_137 = arith.constant 0 : index
    %c19_138 = arith.constant 19 : index
    %206 = vector.load %arg9[%c0_137, %c19_138] : memref<8x342xbf16, #tpu.memory_space<vmem>>, vector<8x288xbf16>
    %c32_139 = arith.constant 32 : index
    %c0_140 = arith.constant 0 : index
    %207 = vector.load %arg10[%c32_139, %c0_140] : memref<72x288xbf16, #tpu.memory_space<vmem>>, vector<8x288xbf16>
    tpu.vector_store %arg10[%c32_139, %c0_140], %206 {strides = array<i32>} : memref<72x288xbf16, #tpu.memory_space<vmem>>, vector<8x288xbf16>,
    %c0_141 = arith.constant 0 : index
    %c20 = arith.constant 20 : index
    %208 = vector.load %arg9[%c0_141, %c20] : memref<8x342xbf16, #tpu.memory_space<vmem>>, vector<8x288xbf16>
    %c40 = arith.constant 40 : index
    %c0_142 = arith.constant 0 : index
    %209 = vector.load %arg10[%c40, %c0_142] : memref<72x288xbf16, #tpu.memory_space<vmem>>, vector<8x288xbf16>
    tpu.vector_store %arg10[%c40, %c0_142], %208 {strides = array<i32>} : memref<72x288xbf16, #tpu.memory_space<vmem>>, vector<8x288xbf16>,
    %c0_143 = arith.constant 0 : index
    %c36 = arith.constant 36 : index
    %210 = vector.load %arg9[%c0_143, %c36] : memref<8x342xbf16, #tpu.memory_space<vmem>>, vector<8x288xbf16>
    %c48_144 = arith.constant 48 : index
    %c0_145 = arith.constant 0 : index
    %211 = vector.load %arg10[%c48_144, %c0_145] : memref<72x288xbf16, #tpu.memory_space<vmem>>, vector<8x288xbf16>
    tpu.vector_store %arg10[%c48_144, %c0_145], %210 {strides = array<i32>} : memref<72x288xbf16, #tpu.memory_space<vmem>>, vector<8x288xbf16>,
    %c0_146 = arith.constant 0 : index
    %c37_147 = arith.constant 37 : index
    %212 = vector.load %arg9[%c0_146, %c37_147] : memref<8x342xbf16, #tpu.memory_space<vmem>>, vector<8x288xbf16>
    %c56 = arith.constant 56 : index
    %c0_148 = arith.constant 0 : index
    %213 = vector.load %arg10[%c56, %c0_148] : memref<72x288xbf16, #tpu.memory_space<vmem>>, vector<8x288xbf16>
    tpu.vector_store %arg10[%c56, %c0_148], %212 {strides = array<i32>} : memref<72x288xbf16, #tpu.memory_space<vmem>>, vector<8x288xbf16>,
    %c0_149 = arith.constant 0 : index
    %c38 = arith.constant 38 : index
    %214 = vector.load %arg9[%c0_149, %c38] : memref<8x342xbf16, #tpu.memory_space<vmem>>, vector<8x288xbf16>
    %c64_150 = arith.constant 64 : index
    %c0_151 = arith.constant 0 : index
    %215 = vector.load %arg10[%c64_150, %c0_151] : memref<72x288xbf16, #tpu.memory_space<vmem>>, vector<8x288xbf16>
    tpu.vector_store %arg10[%c64_150, %c0_151], %214 {strides = array<i32>} : memref<72x288xbf16, #tpu.memory_space<vmem>>, vector<8x288xbf16>,
    %c0_152 = arith.constant 0 : index
    %c0_153 = arith.constant 0 : index
    %216 = vector.load %arg5[%c0_152, %c0_153] : memref<8x72xbf16, #tpu.memory_space<vmem>>, vector<8x72xbf16>
    %c0_154 = arith.constant 0 : index
    %c0_155 = arith.constant 0 : index
    %217 = vector.load %arg10[%c0_154, %c0_155] : memref<72x288xbf16, #tpu.memory_space<vmem>>, vector<72x288xbf16>
    %cst_156 = arith.constant dense<0.000000e+00> : vector<8x288xf32>
    %218 = tpu.matmul %216, %217, %cst_156 {dimension_numbers = #tpu.dot_dimension_numbers<[1], [0], [0], [1], [0, 0, 1, 1], [], []>} : vector<8x72xbf16>, vector<72x288xbf16>, vector<8x288xf32> -> vector<8x288xf32>
    %c0_157 = arith.constant 0 : index
    %c0_158 = arith.constant 0 : index
    %219 = vector.load %arg6[%c0_157, %c0_158] : memref<8x1xf32, #tpu.memory_space<vmem>>, vector<8x1xf32>
    %220 = vector.broadcast %219 : vector<8x1xf32> to vector<8x288xf32>
    %221 = arith.addf %218, %220 : vector<8x288xf32>
    %222 = tpu.iota {dimensions = array<i32: 1>} : vector<1x288xi32>
    %c18_i32 = arith.constant 18 : i32
    %c0_i32_159 = arith.constant 0 : i32
    %223 = arith.cmpi eq, %c18_i32, %c0_i32_159 : i32
    %c1_i32_160 = arith.constant 1 : i32
    %224 = arith.select %223, %c1_i32_160, %c18_i32 : i32
    %225 = vector.broadcast %224 : i32 to vector<1x288xi32>
    %226 = arith.remsi %222, %225 : vector<1x288xi32>
    %c0_i32_161 = arith.constant 0 : i32
    %227 = vector.broadcast %c0_i32_161 : i32 to vector<1x288xi32>
    %228 = arith.cmpi ne, %226, %227 : vector<1x288xi32>
    %c0_i32_162 = arith.constant 0 : i32
    %229 = vector.broadcast %c0_i32_162 : i32 to vector<1x288xi32>
    %230 = arith.cmpi slt, %226, %229 : vector<1x288xi32>
    %c0_i32_163 = arith.constant 0 : i32
    %231 = arith.cmpi slt, %224, %c0_i32_163 : i32
    %232 = vector.broadcast %231 : i1 to vector<1x288xi1>
    %233 = vector.broadcast %232 : vector<1x288xi1> to vector<1x288xi1>
    %234 = arith.xori %230, %233 : vector<1x288xi1>
    %235 = arith.andi %234, %228 : vector<1x288xi1>
    %236 = vector.broadcast %224 : i32 to vector<1x288xi32>
    %237 = arith.addi %226, %236 : vector<1x288xi32>
    %238 = arith.select %235, %237, %226 : vector<1x288xi1>, vector<1x288xi32>
    %c16_i32 = arith.constant 16 : i32
    %239 = vector.broadcast %c16_i32 : i32 to vector<1x288xi32>
    %240 = arith.cmpi slt, %238, %239 : vector<1x288xi32>
    %241 = arith.extui %240 : vector<1x288xi1> to vector<1x288xi32>
    %242 = arith.sitofp %241 : vector<1x288xi32> to vector<1x288xf32>
    %243 = vector.broadcast %242 : vector<1x288xf32> to vector<8x288xf32>
    %244 = arith.mulf %221, %243 : vector<8x288xf32>
    %cst_164 = arith.constant dense<0.000000e+00> : vector<8xf32>
    %245 = vector.multi_reduction <add>, %244, %cst_164 [1] : vector<8x288xf32> to vector<8xf32>
    %246 = vector.shape_cast %245 : vector<8xf32> to vector<8x1xf32>
    %c0_165 = arith.constant 0 : index
    %c0_166 = arith.constant 0 : index
    %c0_167 = arith.constant 0 : index
    %247 = vector.load %arg8[%c0_165, %c0_166, %c0_167] : memref<1x8x2xf32, #tpu.memory_space<vmem>>, vector<1x8x1xf32>
    %248 = vector.shape_cast %247 : vector<1x8x1xf32> to vector<8x1xf32>
    %249 = vector.shape_cast %246 : vector<8x1xf32> to vector<1x8x1xf32>
    tpu.vector_store %arg8[%c0_165, %c0_166, %c0_167], %249 {strides = array<i32>} : memref<1x8x2xf32, #tpu.memory_space<vmem>>, vector<1x8x1xf32>,
    %250 = arith.mulf %244, %221 : vector<8x288xf32>
    %cst_168 = arith.constant dense<0.000000e+00> : vector<8xf32>
    %251 = vector.multi_reduction <add>, %250, %cst_168 [1] : vector<8x288xf32> to vector<8xf32>
    %252 = vector.shape_cast %251 : vector<8xf32> to vector<8x1xf32>
    %c0_169 = arith.constant 0 : index
    %c0_170 = arith.constant 0 : index
    %c1_171 = arith.constant 1 : index
    %253 = vector.load %arg8[%c0_169, %c0_170, %c1_171] : memref<1x8x2xf32, #tpu.memory_space<vmem>>, vector<1x8x1xf32>
    %254 = vector.shape_cast %253 : vector<1x8x1xf32> to vector<8x1xf32>
    %255 = vector.shape_cast %252 : vector<8x1xf32> to vector<1x8x1xf32>
    tpu.vector_store %arg8[%c0_169, %c0_170, %c1_171], %255 {strides = array<i32>} : memref<1x8x2xf32, #tpu.memory_space<vmem>>, vector<1x8x1xf32>,
    %256 = arith.truncf %221 : vector<8x288xf32> to vector<8x288xbf16>
    %c0_172 = arith.constant 0 : index
    %c0_173 = arith.constant 0 : index
    %c0_174 = arith.constant 0 : index
    %257 = vector.load %arg7[%c0_172, %c0_173, %c0_174] : memref<1x8x288xbf16, #tpu.memory_space<vmem>>, vector<1x8x288xbf16>
    %258 = vector.shape_cast %257 : vector<1x8x288xbf16> to vector<8x288xbf16>
    %259 = vector.shape_cast %256 : vector<8x288xbf16> to vector<1x8x288xbf16>
    tpu.vector_store %arg7[%c0_172, %c0_173, %c0_174], %259 {strides = array<i32>} : memref<1x8x288xbf16, #tpu.memory_space<vmem>>, vector<1x8x288xbf16>,
    return
  }
  func.func @transform_0(%arg0: i32) -> (i32, i32, i32) {
    %c0_i32 = arith.constant 0 : i32
    %c0_i32_0 = arith.constant 0 : i32
    %c0_i32_1 = arith.constant 0 : i32
    return %arg0, %c0_i32, %c0_i32_0 : i32, i32, i32
  }
  func.func @transform_1(%arg0: i32) -> (i32, i32, i32) {
    %c0_i32 = arith.constant 0 : i32
    %c0_i32_0 = arith.constant 0 : i32
    %c0_i32_1 = arith.constant 0 : i32
    return %arg0, %c0_i32, %c0_i32_0 : i32, i32, i32
  }
  func.func @transform_2(%arg0: i32) -> (i32, i32) {
    %c0_i32 = arith.constant 0 : i32
    %c0_i32_0 = arith.constant 0 : i32
    %c0_i32_1 = arith.constant 0 : i32
    return %c0_i32, %c0_i32_0 : i32, i32
  }
  func.func @transform_3(%arg0: i32) -> (i32, i32) {
    %c0_i32 = arith.constant 0 : i32
    %c0_i32_0 = arith.constant 0 : i32
    %c0_i32_1 = arith.constant 0 : i32
    return %c0_i32, %c0_i32_0 : i32, i32
  }
  func.func @transform_4(%arg0: i32) -> (i32, i32) {
    %c0_i32 = arith.constant 0 : i32
    %c0_i32_0 = arith.constant 0 : i32
    %c0_i32_1 = arith.constant 0 : i32
    return %c0_i32, %c0_i32_0 : i32, i32
  }
  func.func @transform_5(%arg0: i32) -> (i32, i32) {
    %c0_i32 = arith.constant 0 : i32
    %c0_i32_0 = arith.constant 0 : i32
    %c0_i32_1 = arith.constant 0 : i32
    return %c0_i32, %c0_i32_0 : i32, i32
  }
  func.func @transform_6(%arg0: i32) -> (i32, i32, i32) {
    %c0_i32 = arith.constant 0 : i32
    %c0_i32_0 = arith.constant 0 : i32
    %c0_i32_1 = arith.constant 0 : i32
    return %arg0, %c0_i32, %c0_i32_0 : i32, i32, i32
  }
  func.func @transform_7(%arg0: i32) -> (i32, i32, i32) {
    %c0_i32 = arith.constant 0 : i32
    %c0_i32_0 = arith.constant 0 : i32
    %c0_i32_1 = arith.constant 0 : i32
    return %arg0, %c0_i32, %c0_i32_0 : i32, i32, i32
  }
}

</mosaic_0001>

<bundles_post_ra>
// kernel: tile.8
= control target key start
LH: loop header
LB: loop body
LE: loop exit
PB: predicated region body
PF: predicated region fallthrough
CT: control target
= control target key end

     0   :  { %2 = vsyncpa [#allocation1], 0  ;;  %s44_s6 = smov [#allocation0]   ;;  %s70_s0 = inlined_call_operand.hbm [shape: f32[8], index: 0, kind: input, shape index: {}]   ;;  %s71_s1 = inlined_call_operand.vmem [shape: f32[4,8], index: 1, kind: output, shape index: {}]  }
   0x1   :  { %s9_s7 = sshll.u32 %s44_s6, 4  ;;  %s20_s10 = scalar_lea.hbm %s70_s0, 16  ;;  %s10_s7 = int_to_ptr.vmem [resolvable:$true] %s9_s7 }
   0x2   :  { %p21_p0 = scmp.ne.s32.totalorder %s70_s0, %s20_s10  ;;  %p24_p1 = scmp.lt.u32.totalorder %s20_s10, %s70_s0 }
   0x4   :  { %p26_p2 = pnand %p24_p1, %p21_p0 }
   0x6   :  { %29 = shalt.err (!%p26_p2)
}
   0x7   :  { %s30_s15 = scalar_lea.vmem %s10_s7, 16  ;;  %s34_s16 = scalar_lea.vmem %s10_s7, 32 }
   0x8   :  { %p31_p3 = scmp.ne.s32.totalorder %s10_s7, %s30_s15  ;;  %p35_p4 = scmp.lt.s32.totalorder %s10_s7, %s10_s7 }
   0x9   :  { %p36_p5 = scmp.lt.s32.totalorder %s34_s16, %s30_s15 }
   0xb   :  { %p37_p6 = por %p36_p5, %p35_p4 }
   0xd   :  { %p38_p7 = pnand %p37_p6, %p31_p3 }
   0xf   :  { %41 = shalt.err (!%p38_p7)
}
  0x10   :  { %12 = dma.hbm_to_vmem [thread:$0]  %s70_s0, 16, %s10_s7, [#allocation1]  }
  0x11   :  { %42 = dma.done.wait [#allocation1], 16  }
  0x12   :  { %43 = vsyncadd [#allocation1], 4294967280  ;;  %v16_v0 = vld [vmem:[#allocation0] ss:$0 sm:$0xff] }
  0x13   :  { %17 = vst [vmem:[%s71_s1] sm:$0xf] %v16_v0 }
  0x14   :  { %18 = vsyncpa [#allocation1], 1 }

// kernel: tile.0
= control target key start
LH: loop header
LB: loop body
LE: loop exit
PB: predicated region body
PF: predicated region fallthrough
CT: control target
= control target key end

     0   :  { %s66_s8 = smov 125   ;;  %vm7_vm0 = vcmask 7168   ;;  %s67_s11 = smov 126   ;;  %s117_s0 = inlined_call_operand.vmem [shape: f32[4,8], index: 0, kind: input, shape index: {}]   ;;  %s118_s1 = inlined_call_operand.vmem [shape: f32[32,1], index: 1, kind: output, shape index: {}]  }
   0x1   :  { %v4_v0 = vld [vmem:[%s117_s0] sm:$0xf]  ;;  %s65_s0 = smov 127   ;;  %s68_s12 = smov 124  }
   0x2   :  { %5 = vst [vmem:[#allocation0] sm:$0xf] %v4_v0  ;;  %s69_s13 = smov 123   ;;  %s70_s14 = smov 122  }
   0x3   :  { %s71_s15 = smov 121  }
   0x9   :  { %v9_v1 = vld [vmem:[#allocation0] sm:$0xf]  }
   0xa   :  { %v21_v2 = vld [vmem:[#allocation0] sm:$0xf]   ;;  %10 = vrot.lane.b32.xlu0 %v9_v1, %s65_s0 }
   0xb   :  { %22 = vrot.lane.b32.xlu1 %v21_v2, %s66_s8  ;;  %v15_v3 = vld [vmem:[#allocation0] sm:$0xf]  }
   0xc   :  { %v27_v4 = vld [vmem:[#allocation0] sm:$0xf]  }
   0xd   :  { %v6_v5 = vld [vmem:[#allocation0] sm:$0xf]  }
   0xe   :  { %8 = vst.msk [vmem:[%s118_s1] ss:$8 sm:$0xf] %vm7_vm0, %v6_v5   ;;  %16 = vrot.lane.b32.xlu0 %v15_v3, %s67_s11  ;;  %v33_v6 = vld [vmem:[#allocation0] sm:$0xf]  }
   0xf   :  { %28 = vrot.lane.b32.xlu1 %v27_v4, %s68_s12  ;;  %v39_v7 = vld [vmem:[#allocation0] sm:$0xf]  }
  0x10   :  { %v45_v8 = vld [vmem:[#allocation0] sm:$0xf]  }
  0x12   :  { %34 = vrot.lane.b32.xlu0 %v33_v6, %s69_s13 }
  0x13   :  { %40 = vrot.lane.b32.xlu1 %v39_v7, %s70_s14 }
  0x16   :  { %46 = vrot.lane.b32.xlu0 %v45_v8, %s71_s15 }
  0x7c   :  { %v11_v9 = vpop.permute.xlu0 %10  }
  0x7d   :  { %v23_v10 = vpop.permute.xlu1 %22   ;;  %51 = vst.msk [vmem:[%s118_s1 + $0x1] ss:$8 sm:$0xf] %vm7_vm0, %v11_v9  }
  0x7e   :  { %53 = vst.msk [vmem:[%s118_s1 + $0x3] ss:$8 sm:$0xf] %vm7_vm0, %v23_v10  }
  0x80   :  { %v17_v11 = vpop.permute.xlu0 %16  }
  0x81   :  { %v29_v12 = vpop.permute.xlu1 %28   ;;  %52 = vst.msk [vmem:[%s118_s1 + $0x2] ss:$8 sm:$0xf] %vm7_vm0, %v17_v11  }
  0x82   :  { %54 = vst.msk [vmem:[%s118_s1 + $0x4] ss:$8 sm:$0xf] %vm7_vm0, %v29_v12  }
  0x84   :  { %v35_v13 = vpop.permute.xlu0 %34  }
  0x85   :  { %v41_v14 = vpop.permute.xlu1 %40   ;;  %55 = vst.msk [vmem:[%s118_s1 + $0x5] ss:$8 sm:$0xf] %vm7_vm0, %v35_v13  }
  0x86   :  { %56 = vst.msk [vmem:[%s118_s1 + $0x6] ss:$8 sm:$0xf] %vm7_vm0, %v41_v14  }
  0x88   :  { %v47_v15 = vpop.permute.xlu0 %46  }
  0x89   :  { %57 = vst.msk [vmem:[%s118_s1 + $0x7] ss:$8 sm:$0xf] %vm7_vm0, %v47_v15  }

// kernel: up_single_forward.3
= control target key start
LH: loop header
LB: loop body
LE: loop exit
PB: predicated region body
PF: predicated region fallthrough
CT: control target
= control target key end

     0   :  { %s413_s12 = smov 0   ;;  %s456_s0 = inlined_call_operand.vmem [shape: bf16[2,8,288], index: 0, kind: input, shape index: {}]   ;;  %s457_s1 = inlined_call_operand.vmem [shape: f32[8,1], index: 1, kind: input, shape index: {}]   ;;  %s458_s2 = inlined_call_operand.vmem [shape: f32[8,1], index: 2, kind: input, shape index: {}]   ;;  %s459_s3 = inlined_call_operand.vmem [shape: f32[2,8,256], index: 3, kind: output, shape index: {}]  }
   0x1 LB: > { %s332_s13 = sadd.s32 4294967295, %s375_s12   ;;  %p336_p0 = scmp.ge.s32.totalorder %s375_s12, 1  ;;  %s375_s12 = sphi %s413_s12, %s13_s12  }
   0x2   : > { %p137_p1 = scmp.lt.s32.totalorder %s375_s12, 3 }
   0x4   : > { %p138_p2 = pnand %p336_p0, %p137_p1 }
   0x5   : > { %v176_v0 = vld [vmem:[%s457_s1] sm:$0xff] (!%p138_p2)  ;;  %v377_v1 = vmov (!%p138_p2), 0   ;;  %p161_p3 = scmp.lt.s32.totalorder (!%p138_p2), %s332_s13, 1  ;;  %vm197_vm0 = vcmask (!%p138_p2), 130048   ;;  %s378_s26 = smov (!%p138_p2), 110   ;;  %vm203_vm1 = vcmask (!%p138_p2), 261248  }
   0x6   : > { %141 = sbr.rel (%p138_p2) target bundleno = 292 (0x124), region = 32  ;;  %368 = vset.pattern.permute.xlu0 (!%p138_p2), %v377_v1  ;;  %v185_v2 = vld [vmem:[%s458_s2] sm:$0xff] (!%p138_p2)  ;;  %s379_s27 = smov (!%p138_p2), 112   ;;  %vm208_vm2 = vcmask (!%p138_p2), 392448   ;;  %vm213_vm3 = vcmask (!%p138_p2), 523648   ;;  %vm218_vm4 = vcmask (!%p138_p2), 654848  }
   0x7   : > { %179 = vperm.xlu0 (!%p138_p2), %368, %v176_v0   ;;  %s380_s28 = smov (!%p138_p2), 108   ;;  %s381_s29 = smov (!%p138_p2), 126   ;;  %vm223_vm5 = vcmask (!%p138_p2), 786048   ;;  %vm269_vm6 = vcmask (!%p138_p2), 818176   ;;  %vm228_vm7 = vcmask (!%p138_p2), 917248   ;;  %vm238_vm8 = vcmask (!%p138_p2), 1048448  }
   0x8   : > { %s382_s30 = smov (!%p138_p2), 106   ;;  %s383_s4 = smov (!%p138_p2), 124   ;;  %vm235_vm9 = vcmask (!%p138_p2), 932864  }
   0x9   : > { %s384_s5 = smov (!%p138_p2), 104   ;;  %s385_s6 = smov (!%p138_p2), 122  }
   0xa   : > { %s386_s7 = smov (!%p138_p2), 102   ;;  %s387_s8 = smov (!%p138_p2), 120  }
   0xb   : > { %188 = vperm.xlu0 (!%p138_p2), %368, %v185_v2   ;;  %s388_s9 = smov (!%p138_p2), 100   ;;  %s389_s10 = smov (!%p138_p2), 118  }
   0xc   : > { %s390_s11 = smov (!%p138_p2), 114   ;;  %s392_s14 = smov (!%p138_p2), 116  }
   0xd   : > { %s461_s13 = smov (!%p161_p3, %s332_s13), 1 }
   0xe   : > { %s343_s18 = smul.u32 12, %s461_s13  ;;  %s342_s22 = sshll.u32 %s461_s13, 4 }
   0xf   : > { %s433_s25 = scalar_lea.vmem %s459_s3, %s342_s22  ;;  %s391_s13 = smov 98  }
  0x10   : > { %s165_s21 = scalar_lea.vmem %s456_s0, %s343_s18 }
  0x11   : > { %v171_v3 = vld [vmem:[%s165_s21] sm:$0xff]  ;;  %v172_v14 = vld [vmem:[%s165_s21 + $0x8] sm:$0xf] }
  0x12   : > { %v173_v4 = vunpack.c.l.bf16 %v171_v3  ;;  %v174_v5 = vunpack.c.h.bf16 %v171_v3  ;;  %v175_v15 = vunpack.c.l.bf16 %v172_v14 }
  0x86   : > { %v180_v6 = vpop.permute.xlu0 %179 }
  0x87   : > { %v182_v7 = vmul.f32 %v180_v6, %v173_v4  ;;  %v183_v8 = vmul.f32 %v180_v6, %v174_v5  ;;  %v184_v16 = vmul.f32 %v180_v6, %v175_v15 }
  0x8a   : > { %v189_v9 = vpop.permute.xlu0 %188 }
  0x8b   : > { %v191_v10 = vadd.f32 %v189_v9, %v182_v7  ;;  %v192_v11 = vadd.f32 %v189_v9, %v183_v8  ;;  %v193_v17 = vadd.f32 %v189_v9, %v184_v16 }
  0x8d   : > { %v194_v12 = vmax.f32 %v191_v10, 0.0  ;;  %v195_v13 = vmax.f32 %v192_v11, 0.0  ;;  %v196_v18 = vmax.f32 %v193_v17, 0.0 }
  0x8f   : > { %244 = vrot.lane.b32.xlu0 %v195_v13, %s378_s26  ;;  %240 = vrot.lane.b32.xlu1 %v195_v13, %s379_s27  ;;  %198 = vst.msk [vmem:[%s433_s25] sm:$0xff] %vm197_vm0, %v194_v12 }
  0x93   : > { %248 = vrot.lane.b32.xlu0 %v195_v13, %s380_s28  ;;  %200 = vrot.lane.b32.xlu1 %v194_v12, %s381_s29 }
  0x97   : > { %252 = vrot.lane.b32.xlu0 %v195_v13, %s382_s30  ;;  %205 = vrot.lane.b32.xlu1 %v194_v12, %s383_s4 }
  0x9b   : > { %256 = vrot.lane.b32.xlu0 %v195_v13, %s384_s5  ;;  %210 = vrot.lane.b32.xlu1 %v194_v12, %s385_s6 }
  0x9f   : > { %260 = vrot.lane.b32.xlu0 %v195_v13, %s386_s7  ;;  %215 = vrot.lane.b32.xlu1 %v194_v12, %s387_s8 }
  0xa3   : > { %267 = vrot.lane.b32.xlu0 %v196_v18, %s388_s9  ;;  %220 = vrot.lane.b32.xlu1 %v194_v12, %s389_s10 }
  0xa7   : > { %231 = vrot.lane.b32.xlu0 %v194_v12, %s390_s11  ;;  %265 = vrot.lane.b32.xlu1 %v195_v13, %s388_s9 }
  0xab   : > { %273 = vrot.lane.b32.xlu0 %v196_v18, %s391_s13  ;;  %225 = vrot.lane.b32.xlu1 %v194_v12, %s392_s14 }
  0xaf   : > { %233 = vrot.lane.b32.xlu1 %v195_v13, %s390_s11 }
 0x101   : > { %v245_v19 = vpop.permute.xlu0 %244  ;;  %v241_v20 = vpop.permute.xlu1 %240 }
 0x102   : > { %243 = vst.msk [vmem:[%s433_s25 + $0x8] sm:$0xff] %vm197_vm0, %v241_v20 }
 0x103   : > { %247 = vst.msk [vmem:[%s433_s25 + $0x8] sm:$0xff] %vm203_vm1, %v245_v19 }
 0x105   : > { %v249_v21 = vpop.permute.xlu0 %248  ;;  %v201_v22 = vpop.permute.xlu1 %200 }
 0x106   : > { %251 = vst.msk [vmem:[%s433_s25 + $0x8] sm:$0xff] %vm208_vm2, %v249_v21 }
 0x107   : > { %204 = vst.msk [vmem:[%s433_s25] sm:$0xff] %vm203_vm1, %v201_v22 }
 0x109   : > { %v253_v23 = vpop.permute.xlu0 %252  ;;  %v206_v24 = vpop.permute.xlu1 %205 }
 0x10a   : > { %255 = vst.msk [vmem:[%s433_s25 + $0x8] sm:$0xff] %vm213_vm3, %v253_v23 }
 0x10b   : > { %209 = vst.msk [vmem:[%s433_s25] sm:$0xff] %vm208_vm2, %v206_v24 }
 0x10d   : > { %v257_v25 = vpop.permute.xlu0 %256  ;;  %v211_v26 = vpop.permute.xlu1 %210 }
 0x10e   : > { %259 = vst.msk [vmem:[%s433_s25 + $0x8] sm:$0xff] %vm218_vm4, %v257_v25 }
 0x10f   : > { %214 = vst.msk [vmem:[%s433_s25] sm:$0xff] %vm213_vm3, %v211_v26 }
 0x111   : > { %v261_v27 = vpop.permute.xlu0 %260  ;;  %v216_v28 = vpop.permute.xlu1 %215 }
 0x112   : > { %263 = vst.msk [vmem:[%s433_s25 + $0x8] sm:$0xff] %vm223_vm5, %v261_v27 }
 0x113   : > { %219 = vst.msk [vmem:[%s433_s25] sm:$0xff] %vm218_vm4, %v216_v28 }
 0x115   : > { %v268_v29 = vpop.permute.xlu0 %267  ;;  %v221_v30 = vpop.permute.xlu1 %220 }
 0x116   : > { %224 = vst.msk [vmem:[%s433_s25] sm:$0xff] %vm223_vm5, %v221_v30 }
 0x119   : > { %v232_v31 = vpop.permute.xlu0 %231  ;;  %v266_v32 = vpop.permute.xlu1 %265 }
 0x11a   : > { %v270_v33 = vsel %vm269_vm6, %v266_v32, %v268_v29 }
 0x11b   : > { %272 = vst.msk [vmem:[%s433_s25 + $0x8] sm:$0xff] %vm228_vm7, %v270_v33 }
 0x11d   : > { %v274_v34 = vpop.permute.xlu0 %273  ;;  %v226_v35 = vpop.permute.xlu1 %225 }
 0x11e   : > { %276 = vst.msk [vmem:[%s433_s25 + $0x8] sm:$0xff] %vm238_vm8, %v274_v34 }
 0x11f   : > { %229 = vst.msk [vmem:[%s433_s25] sm:$0xff] %vm228_vm7, %v226_v35 }
 0x121   : > { %v234_v36 = vpop.permute.xlu1 %233 }
 0x122   : > { %v236_v37 = vsel %vm235_vm9, %v232_v31, %v234_v36 }
 0x123   : > { %239 = vst.msk [vmem:[%s433_s25] sm:$0xff] %vm238_vm8, %v236_v37 }
 0x124 PF: > { %s13_s12 = sadd.s32 1, %s375_s12  }
 0x125   : > { %p10_p4 = scmp.ge.s32.totalorder %s13_s12, 4  }
 0x127   :  { %12 = sbr.rel (!%p10_p4) target bundleno = 1 (0x1), region = 62 }

// kernel: up_single_forward.2
= control target key start
LH: loop header
LB: loop body
LE: loop exit
PB: predicated region body
PF: predicated region fallthrough
CT: control target
= control target key end

     0   :  { %s1527_s24 = smov 0   ;;  %s1750_s0 = inlined_call_operand.vmem [shape: bf16[2,8,128], index: 0, kind: input, shape index: {}]   ;;  %s1751_s1 = inlined_call_operand.vmem [shape: f32[2,8,256], index: 1, kind: input, shape index: {}]   ;;  %s1752_s2 = inlined_call_operand.vmem [shape: bf16[32,8], index: 2, kind: input, shape index: {}]   ;;  %s1753_s3 = inlined_call_operand.vmem [shape: f32[32,1], index: 3, kind: input, shape index: {}]   ;;  %s1754_s4 = inlined_call_operand.vmem [shape: bf16[8,72], index: 4, kind: input, shape index: {}]   ;;  %s1755_s5 = inlined_call_operand.vmem [shape: f32[8,1], index: 5, kind: input, shape index: {}]   ;;  %s1756_s6 = inlined_call_operand.vmem [shape: bf16[2,8,288], index: 6, kind: output, shape index: {0}]   ;;  %s1757_s7 = inlined_call_operand.vmem [shape: f32[2,8,2], index: 7, kind: output, shape index: {1}]  }
   0x1 LB: > { %s1273_s25 = sadd.s32 4294967295, %s1448_s24   ;;  %p1277_p0 = scmp.ge.s32.totalorder %s1448_s24, 1  ;;  %s1448_s24 = sphi %s1527_s24, %s18_s24  }
   0x2   : > { %p249_p1 = scmp.lt.s32.totalorder %s1448_s24, 3 }
   0x4   : > { %p250_p2 = pnand %p1277_p0, %p249_p1 }
   0x5   : > { %p289_p3 = scmp.lt.s32.totalorder (!%p250_p2), %s1273_s25, 1  ;;  %v1435_v0 = vld [vmem:[%s1752_s2] sm:$0xff] (!%p250_p2)   ;;  %vm520_vm0 = vcmask (!%p250_p2), 64512   ;;  %v1450_v2 = vmov (!%p250_p2), 0   ;;  %vm1758_vm1 = vcmask (!%p250_p2), 1043456   ;;  %v487_v3 = vld [vmem:[%s1753_s3 + $0x8] sm:$0xff] (!%p250_p2)  ;;  %v580_v21 = vlaneseq (!%p250_p2) }
   0x6   : > { %253 = sbr.rel (%p250_p2) target bundleno = 1093 (0x445), region = 44  ;;  %v486_v1 = vld [vmem:[%s1753_s3] sm:$0xff] (!%p250_p2)  ;;  %1362 = vmatprep.mubr.msk.bf16.mxu0 (!%p250_p2), %vm520_vm0, %v1435_v0  ;;  %1433 = vset.pattern.permute.xlu0 (!%p250_p2), %v1450_v2  ;;  %308 = vst [vmem:[#allocation2] sm:$0xff] (!%p250_p2), %v1450_v2  ;;  %v1436_v7 = vld [vmem:[%s1752_s2 + $0x8] sm:$0xff] (!%p250_p2)   ;;  %s1451_s19 = smov (!%p250_p2), 19   ;;  %vm319_vm2 = vcmask (!%p250_p2), 281752  }
   0x7   : > { %492 = vperm.xlu0 (!%p250_p2), %1433, %v486_v1   ;;  %1434 = vset.pattern.permute.xlu1 (!%p250_p2), %v1450_v2  ;;  %s1452_s20 = smov (!%p250_p2), 23   ;;  %s1453_s21 = smov (!%p250_p2), 21   ;;  %vm329_vm3 = vcmask (!%p250_p2), 429352   ;;  %vm339_vm4 = vcmask (!%p250_p2), 576952   ;;  %vm349_vm5 = vcmask (!%p250_p2), 724552   ;;  %vm359_vm6 = vcmask (!%p250_p2), 872152  }
   0x8   : > { %1031 = vmatprep.mubr.bf16.mxu1 (!%p250_p2), %v1450_v2  ;;  %s1454_s22 = smov (!%p250_p2), 31   ;;  %s1455_s23 = smov (!%p250_p2), 25   ;;  %vm379_vm7 = vcmask (!%p250_p2), 252928   ;;  %vm382_vm8 = vcmask (!%p250_p2), 1044472   ;;  %vm383_vm9 = vcmask (!%p250_p2), 121860   ;;  %vm1759_vm10 = vcmask (!%p250_p2), 1019752  }
   0x9   : > { %s1456_s26 = smov (!%p250_p2), 29   ;;  %s1457_s27 = smov (!%p250_p2), 27   ;;  %vm1585_vm11 = vmor (!%p250_p2), %vm383_vm9, %vm382_vm8  ;;  %v1592_v22 = vand.u32 (!%p250_p2), 127, %v580_v21  ;;  %v488_v34 = vld [vmem:[%s1753_s3 + $0x10] sm:$0xff] (!%p250_p2)  ;;  %v489_v35 = vld [vmem:[%s1753_s3 + $0x18] sm:$0xff] (!%p250_p2)  ;;  %vm309_vm13 = vcmask (!%p250_p2), 699392  }
   0xa   : > { %s1458_s28 = smov (!%p250_p2), 39   ;;  %s1459_s29 = smov (!%p250_p2), 35   ;;  %310 = vst.msk [vmem:[#allocation2 + $0x8] sm:$0xf] (!%p250_p2), %vm309_vm13, %v1450_v2  ;;  %vm394_vm14 = vcmask (!%p250_p2), 265352   ;;  %vm404_vm15 = vcmask (!%p250_p2), 412952  }
   0xb   : > { %497 = vperm.xlu0 (!%p250_p2), %1433, %v487_v3   ;;  %v586_v23 = vand.u32 (!%p250_p2), 1, %v1592_v22  ;;  %s1462_s9 = smov (!%p250_p2), 37   ;;  %s1463_s12 = smov (!%p250_p2), 59   ;;  %vm434_vm8 = vcmask (!%p250_p2), 855752   ;;  %vm458_vm9 = vcmask (!%p250_p2), 105476   ;;  %vm454_vm13 = vcmask (!%p250_p2), 367616  }
   0xc   : > { %s1464_s13 = smov (!%p250_p2), 41   ;;  %s1465_s16 = smov (!%p250_p2), 43   ;;  %v1480_v59 = vmov (!%p250_p2), 0.0  }
   0xd   : > { %s1779_s25 = smov (!%p289_p3, %s1273_s25), 1  ;;  %vm1599_vm12 = vcmp.eq.s32.totalorder %v586_v23, 0  ;;  %s1466_s17 = smov 99  }
   0xe   : > { %s1278_s30 = sshll.u32 %s1779_s25, 2  ;;  %s1330_s8 = sshll.u32 %s1779_s25, 4 }
   0xf   : > { %s292_s11 = scalar_lea.vmem %s1750_s0, %s1278_s30  ;;  %s1555_s14 = scalar_lea.vmem %s1751_s1, %s1330_s8 }
  0x10   : > { %v485_v4 = vld [vmem:[%s292_s11] sm:$0xf]  ;;  %v396_v31 = vld [vmem:[%s1555_s14 + $0x8] sm:$0xff]  ;;  %s1460_s30 = smov 33   ;;  %s1461_s8 = smov 45  }
  0x11   : > { %v311_v5 = vld [vmem:[%s1555_s14] sm:$0xff]  ;;  %1380 = vmatprep.subr.msk.bf16.mxu0 %vm1758_vm1, %v485_v4  ;;  %v529_v6 = vsel %vm1758_vm1, %v485_v4, 0  ;;  %v1611_v33 = vpack.c.bf16 %v396_v31, %v396_v31  ;;  %s1467_s18 = smov 79   ;;  %vm444_vm1 = vcmask 1003352   ;;  %s1481_s10 = smov 109  }
  0x12   : > { %v1567_v8 = vpack.c.bf16 %v311_v5, %v311_v5  ;;  %1361 = vmatpush3.bf16.msra.mxu0 %v529_v6  ;;  %s1482_s11 = smov 108   ;;  %s1485_s14 = smov 90  }
  0x13   : > { %1366 = vmatprep.subr.bf16.mxu0 %v1480_v59 }
  0x14   : > { %316 = vrot.lane.b32.xlu1 %v1567_v8, %s1451_s19  ;;  %336 = vrot.lane.b32.xlu0 %v1567_v8, %s1452_s20  ;;  %s1469_s20 = smov 119  }
  0x15   : > { %1363 = vmatmul.mubr.msk.bf16.vlgmr.msra.gmra.mrb[0].mxu0 %vm520_vm0, %v1436_v7  ;;  %vm414_vm0 = vcmask 560552  }
  0x18   : > { %326 = vrot.lane.b32.xlu1 %v1567_v8, %s1453_s21  ;;  %376 = vrot.lane.b32.xlu0 %v1567_v8, %s1454_s22  ;;  %s1470_s21 = smov 117  }
  0x1c   : > { %346 = vrot.lane.b32.xlu1 %v1567_v8, %s1455_s23  ;;  %366 = vrot.lane.b32.xlu0 %v1567_v8, %s1456_s26  ;;  %s1471_s23 = smov 97  }
  0x20   : > { %356 = vrot.lane.b32.xlu1 %v1567_v8, %s1457_s27  ;;  %s1472_s27 = smov 49  }
  0x86   : > { %v317_v9 = vpop.permute.xlu1 %316  ;;  %v493_v10 = vpop.permute.xlu0 %492 }
  0x87   : > { %320 = vst.msk [vmem:[#allocation2] sm:$0xf] %vm319_vm2, %v317_v9 }
  0x8a   : > { %v327_v11 = vpop.permute.xlu1 %326  ;;  %v498_v12 = vpop.permute.xlu0 %497 }
  0x8b   : > { %330 = vst.msk [vmem:[#allocation2] sm:$0xf] %vm329_vm3, %v327_v11 }
  0x8e   : > { %v347_v13 = vpop.permute.xlu1 %346  ;;  %v337_v14 = vpop.permute.xlu0 %336 }
  0x8f   : > { %340 = vst.msk [vmem:[#allocation2] sm:$0xf] %vm339_vm4, %v337_v14 }
  0x90   : > { %350 = vst.msk [vmem:[#allocation2] sm:$0xf] %vm349_vm5, %v347_v13 }
  0x92   : > { %v357_v15 = vpop.permute.xlu1 %356  ;;  %v377_v16 = vpop.permute.xlu0 %376 }
  0x93   : > { %360 = vst.msk [vmem:[#allocation2] sm:$0xf] %vm359_vm6, %v357_v15  ;;  %v378_v17 = vrot.slane %v377_v16, 4 }
  0x95   : > { %v380_v18 = vsel %vm379_vm7, %v378_v17, %v377_v16  ;;  %vm424_vm7 = vcmask 708152  }
  0x96   : > { %v367_v20 = vpop.permute.xlu0 %366 }
  0x97   : > { %370 = vst.msk [vmem:[#allocation2] sm:$0xf] %vm1759_vm10, %v367_v20 }
  0x98   : > { %385 = vst.msk [vmem:[#allocation2] sm:$0xff] %vm1585_vm11, %v380_v18 }
  0x9f   : > { %v598_v36 = vld [vmem:[#allocation2] sm:$0xf] }
  0xa0   : > { %v599_v37 = vunpack.c.l.bf16 %v598_v36 }
  0xe8   : > { %v1595_v24 = vpop.f32.mrb[0].mxu0 }
  0xe9   : > { %v565_v25 = vpop.f32.mrb[1].mxu0 }
  0xea   : > { %v1597_v26 = vpop.f32.mrb[2].mxu0  ;;  %v566_v29 = vadd.f32 %v565_v25, %v493_v10 }
  0xeb   : > { %v568_v27 = vpop.f32.mrb[3].mxu0 }
  0xec   : > { %v569_v30 = vadd.f32 %v568_v27, %v498_v12 }
  0xee   : > { %v1606_v32 = vsel %vm1599_vm12, %v566_v29, %v569_v30 }
  0xef   : > { %609 = vrot.lane.b32.xlu0 %v1606_v32, %s1458_s28  ;;  %601 = vrot.lane.b32.xlu1 %v1606_v32, %s1451_s19  ;;  %s1468_s19 = smov 11  }
  0xf3   : > { %401 = vrot.lane.b32.xlu0 %v1611_v33, %s1459_s29  ;;  %391 = vrot.lane.b32.xlu1 %v1567_v8, %s1460_s30  ;;  %s1474_s29 = smov 57   ;;  %s1475_s30 = smov 9  }
  0xf7   : > { %451 = vrot.lane.b32.xlu0 %v1611_v33, %s1461_s8  ;;  %411 = vrot.lane.b32.xlu1 %v1611_v33, %s1462_s9  ;;  %s1476_s8 = smov 77  }
  0xfb   : > { %502 = vperm.xlu0 %1433, %v488_v34   ;;  %421 = vrot.lane.b32.xlu1 %v1611_v33, %s1458_s28  ;;  %s1473_s28 = smov 47  }
  0xff   : > { %617 = vrot.lane.b32.xlu0 %v1606_v32, %s1463_s12  ;;  %431 = vrot.lane.b32.xlu1 %v1611_v33, %s1464_s13  ;;  %s1483_s12 = smov 92   ;;  %s1484_s13 = smov 91  }
 0x103   : > { %441 = vrot.lane.b32.xlu0 %v1611_v33, %s1465_s16  ;;  %507 = vperm.xlu1 %1434, %v489_v35  }
 0x107   : > { %642 = vrot.lane.b32.xlu0 %v1606_v32, %s1466_s17  ;;  %626 = vrot.lane.b32.xlu1 %v1606_v32, %s1467_s18 }
 0x10b   : > { %658 = vrot.lane.b32.xlu0 %v1606_v32, %s1468_s19  ;;  %650 = vrot.lane.b32.xlu1 %v1606_v32, %s1469_s20  ;;  %s1381_s19 = smul.u32 12, %s1779_s25 }
 0x161   : > { %v610_v38 = vpop.permute.xlu0 %609  ;;  %v602_v39 = vpop.permute.xlu1 %601 }
 0x162   : > { %v604_v40 = vadd.f32 %v602_v39, %v599_v37 }
 0x164   : > { %v605_v41 = vpack.c.bf16 %v604_v40, %v604_v40 }
 0x165   : > { %v392_v42 = vpop.permute.xlu1 %391  ;;  %v402_v43 = vpop.permute.xlu0 %401 }
 0x166   : > { %606 = vst.msk [vmem:[#allocation2] sm:$0xf] %vm319_vm2, %v605_v41  ;;  %vm457_vm2 = vcmask 1044456  }
 0x167   : > { %395 = vst.msk [vmem:[#allocation2 + $0x4] sm:$0xf] %vm394_vm14, %v392_v42  ;;  %vm1640_vm10 = vmor %vm458_vm9, %vm457_vm2  ;;  %vm832_vm2 = vcmask 883712  }
 0x168   : > { %405 = vst.msk [vmem:[#allocation2 + $0x4] sm:$0xf] %vm404_vm15, %v402_v43 }
 0x169   : > { %v412_v44 = vpop.permute.xlu1 %411  ;;  %v452_v51 = vpop.permute.xlu0 %451 }
 0x16a   : > { %415 = vst.msk [vmem:[#allocation2 + $0x4] sm:$0xf] %vm414_vm0, %v412_v44  ;;  %v453_v56 = vrot.slane %v452_v51, 4 }
 0x16c   : > { %v455_v62 = vsel %vm454_vm13, %v453_v56, %v452_v51  ;;  %vm849_vm13 = vcmask 752640  }
 0x16d   : > { %v607_v45 = vld [vmem:[#allocation2] sm:$0xf]  ;;  %v422_v46 = vpop.permute.xlu1 %421 }
 0x16e   : > { %v608_v47 = vunpack.c.l.bf16 %v607_v45  ;;  %425 = vst.msk [vmem:[#allocation2 + $0x4] sm:$0xf] %vm424_vm7, %v422_v46 }
 0x170   : > { %v612_v48 = vadd.f32 %v610_v38, %v608_v47 }
 0x171   : > { %v432_v49 = vpop.permute.xlu1 %431 }
 0x172   : > { %v613_v50 = vpack.c.bf16 %v612_v48, %v612_v48  ;;  %435 = vst.msk [vmem:[#allocation2 + $0x4] sm:$0xf] %vm434_vm8, %v432_v49 }
 0x174   : > { %614 = vst.msk [vmem:[#allocation2] sm:$0xf] %vm339_vm4, %v613_v50  ;;  %vm469_vm4 = vcmask 248952  }
 0x17a   : > { %v503_v52 = vpop.permute.xlu0 %502 }
 0x17b   : > { %v615_v53 = vld [vmem:[#allocation2] sm:$0xf]  ;;  %v574_v63 = vadd.f32 %v1595_v24, %v503_v52 }
 0x17c   : > { %v616_v54 = vunpack.c.l.bf16 %v615_v53 }
 0x17e   : > { %v618_v55 = vpop.permute.xlu0 %617 }
 0x17f   : > { %v620_v57 = vadd.f32 %v618_v55, %v616_v54 }
 0x181   : > { %v621_v58 = vpack.c.bf16 %v620_v57, %v620_v57 }
 0x182   : > { %v442_v60 = vpop.permute.xlu0 %441  ;;  %v508_v61 = vpop.permute.xlu1 %507 }
 0x183   : > { %622 = vst.msk [vmem:[#allocation2] sm:$0xf] %vm359_vm6, %v621_v58  ;;  %v577_v0 = vadd.f32 %v1597_v26, %v508_v61  ;;  %vm479_vm6 = vcmask 396552  }
 0x184   : > { %445 = vst.msk [vmem:[#allocation2 + $0x4] sm:$0xf] %vm444_vm1, %v442_v60 }
 0x185   : > { %460 = vst.msk [vmem:[#allocation2 + $0x4] sm:$0xff] %vm1640_vm10, %v455_v62  ;;  %v672_v1 = vsel %vm1599_vm12, %v574_v63, %v577_v0  ;;  %vm781_vm12 = vcmask 1031168  }
 0x186   : > { %708 = vrot.lane.b32.xlu0 %v672_v1, %s1470_s21  ;;  %700 = vrot.lane.b32.xlu1 %v672_v1, %s1471_s23  ;;  %v627_v5 = vpop.permute.xlu1 %626  ;;  %v643_v11 = vpop.permute.xlu0 %642  ;;  %s302_s23 = scalar_lea.vmem %s1756_s6, %s1381_s19 }
 0x18a   : > { %476 = vrot.lane.b32.xlu0 %v1611_v33, %s1472_s27  ;;  %466 = vrot.lane.b32.xlu1 %v1611_v33, %s1473_s28  ;;  %v651_v16 = vpop.permute.xlu1 %650  ;;  %v659_v21 = vpop.permute.xlu0 %658 }
 0x18c   : > { %v623_v2 = vld [vmem:[#allocation2] sm:$0xff] }
 0x18d   : > { %v624_v3 = vunpack.c.l.bf16 %v623_v2  ;;  %v625_v4 = vunpack.c.h.bf16 %v623_v2 }
 0x18e   : > { %676 = vrot.lane.b32.xlu0 %v672_v1, %s1462_s9  ;;  %666 = vrot.lane.b32.xlu1 %v1606_v32, %s1454_s22  ;;  %s1477_s22 = smov 127   ;;  %s1479_s9 = smov 110  }
 0x18f   : > { %v629_v6 = vadd.f32 %v627_v5, %v624_v3  ;;  %v630_v7 = vadd.f32 %v627_v5, %v625_v4 }
 0x191   : > { %v1347_v8 = vpack.c.bf16 %v630_v7, %v629_v6 }
 0x192   : > { %684 = vrot.lane.b32.xlu0 %v672_v1, %s1474_s29  ;;  %716 = vrot.lane.b32.xlu1 %v672_v1, %s1475_s30 }
 0x193   : > { %639 = vst.msk [vmem:[#allocation2] sm:$0xff] %vm1585_vm11, %v1347_v8  ;;  %vm1767_vm11 = vcmask 1043456  }
 0x196   : > { %692 = vrot.lane.b32.xlu0 %v672_v1, %s1476_s8  ;;  %725 = vrot.lane.b32.xlu1 %v672_v1, %s1456_s26  ;;  %s1478_s26 = smov 126  }
 0x19a   : > { %v640_v9 = vld [vmem:[#allocation2] sm:$0xff]   ;;  %741 = vrot.lane.b32.xlu1 %v672_v1, %s1472_s27  ;;  %s1282_s27 = sshll.u32 %s1779_s25, 3 }
 0x19b   : > { %v641_v10 = vunpack.c.h.bf16 %v640_v9  ;;  %v674_v33 = vunpack.c.l.bf16 %v640_v9  ;;  %s306_s30 = scalar_lea.vmem %s1757_s7, %s1282_s27 }
 0x19d   : > { %v645_v12 = vadd.f32 %v643_v11, %v641_v10 }
 0x19f   : > { %v646_v13 = vpack.c.bf16 %v645_v12, %v645_v12 }
 0x1a1   : > { %647 = vst.msk [vmem:[#allocation2 + $0x4] sm:$0xf] %vm404_vm15, %v646_v13  ;;  %vm798_vm15 = vcmask 900096  }
 0x1a8   : > { %v648_v14 = vld [vmem:[#allocation2 + $0x4] sm:$0xf] }
 0x1a9   : > { %v649_v15 = vunpack.c.l.bf16 %v648_v14 }
 0x1ab   : > { %v653_v17 = vadd.f32 %v651_v16, %v649_v15  ;;  %v908_v16 = vld [vmem:[%s1755_s5] sm:$0xff] }
 0x1ad   : > { %v654_v18 = vpack.c.bf16 %v653_v17, %v653_v17 }
 0x1af   : > { %655 = vst.msk [vmem:[#allocation2 + $0x4] sm:$0xf] %vm424_vm7, %v654_v18  ;;  %vm815_vm7 = vcmask 891904  }
 0x1b6   : > { %v656_v19 = vld [vmem:[#allocation2 + $0x4] sm:$0xf] }
 0x1b7   : > { %v657_v20 = vunpack.c.l.bf16 %v656_v19 }
 0x1b9   : > { %v661_v23 = vadd.f32 %v659_v21, %v657_v20 }
 0x1bb   : > { %v662_v24 = vpack.c.bf16 %v661_v23, %v661_v23 }
 0x1bd   : > { %663 = vst.msk [vmem:[#allocation2 + $0x4] sm:$0xf] %vm444_vm1, %v662_v24  ;;  %vm1766_vm1 = vcmask 1019752  }
 0x1c4   : > { %v698_v25 = vld [vmem:[#allocation2 + $0x4] sm:$0xf] }
 0x1c5   : > { %v699_v26 = vunpack.c.l.bf16 %v698_v25 }
 0x1f8   : > { %v709_v27 = vpop.permute.xlu0 %708  ;;  %v701_v28 = vpop.permute.xlu1 %700 }
 0x1f9   : > { %v703_v29 = vadd.f32 %v701_v28, %v699_v26 }
 0x1fb   : > { %v704_v30 = vpack.c.bf16 %v703_v29, %v703_v29 }
 0x1fc   : > { %v477_v31 = vpop.permute.xlu0 %476  ;;  %v467_v32 = vpop.permute.xlu1 %466 }
 0x1fd   : > { %705 = vst.msk [vmem:[#allocation2 + $0x4] sm:$0xf] %vm394_vm14, %v704_v30  ;;  %vm1768_vm14 = vmmov %vm1767_vm11 }
 0x1fe   : > { %470 = vst.msk [vmem:[#allocation2 + $0x8] sm:$0xf] %vm469_vm4, %v467_v32 }
 0x1ff   : > { %480 = vst.msk [vmem:[#allocation2 + $0x8] sm:$0xf] %vm479_vm6, %v477_v31 }
 0x200   : > { %v677_v34 = vpop.permute.xlu0 %676  ;;  %v667_v43 = vpop.permute.xlu1 %666 }
 0x201   : > { %v679_v35 = vadd.f32 %v677_v34, %v674_v33 }
 0x203   : > { %v680_v36 = vpack.c.bf16 %v679_v35, %v679_v35 }
 0x204   : > { %v706_v37 = vld [vmem:[#allocation2 + $0x4] sm:$0xf]  ;;  %v685_v44 = vpop.permute.xlu0 %684  ;;  %v717_v50 = vpop.permute.xlu1 %716 }
 0x205   : > { %v707_v38 = vunpack.c.l.bf16 %v706_v37  ;;  %681 = vst.msk [vmem:[#allocation2] sm:$0xf] %vm329_vm3, %v680_v36  ;;  %vm750_vm3 = vcmask 257024  }
 0x207   : > { %v711_v39 = vadd.f32 %v709_v27, %v707_v38 }
 0x208   : > { %v693_v57 = vpop.permute.xlu0 %692  ;;  %v726_v0 = vpop.permute.xlu1 %725 }
 0x209   : > { %v712_v40 = vpack.c.bf16 %v711_v39, %v711_v39 }
 0x20b   : > { %713 = vst.msk [vmem:[#allocation2 + $0x4] sm:$0xf] %vm414_vm0, %v712_v40  ;;  %vm1769_vm0 = vmmov %vm1767_vm11 }
 0x20c   : > { %v682_v41 = vld [vmem:[#allocation2] sm:$0xf]  ;;  %v742_v7 = vpop.permute.xlu1 %741  ;;  %vm1771_vm9 = vmmov %vm1769_vm0 }
 0x20d   : > { %v683_v42 = vunpack.c.l.bf16 %v682_v41 }
 0x20f   : > { %v687_v45 = vadd.f32 %v685_v44, %v683_v42 }
 0x211   : > { %v688_v46 = vpack.c.bf16 %v687_v45, %v687_v45 }
 0x212   : > { %v664_v47 = vld [vmem:[#allocation2 + $0x4] sm:$0xff]  }
 0x213   : > { %v665_v48 = vunpack.c.h.bf16 %v664_v47  ;;  %689 = vst.msk [vmem:[#allocation2] sm:$0xf] %vm349_vm5, %v688_v46  ;;  %v715_v49 = vunpack.c.l.bf16 %v664_v47  ;;  %vm1486_vm5 = vmmov 0  }
 0x214   : > { %1376 = vmatprep.mubr.msk.bf16.mxu0 %vm1486_vm5, %v1480_v59  ;;  %vm883_vm5 = vcmask 736256  }
 0x215   : > { %v669_v51 = vadd.f32 %v667_v43, %v665_v48  ;;  %v719_v52 = vadd.f32 %v717_v50, %v715_v49 }
 0x217   : > { %v670_v53 = vpack.c.bf16 %v669_v51, %v669_v51  ;;  %v720_v54 = vpack.c.bf16 %v719_v52, %v719_v52 }
 0x219   : > { %671 = vst.msk [vmem:[#allocation2 + $0x8] sm:$0xf] %vm469_vm4, %v670_v53  ;;  %vm1772_vm4 = vmmov %vm1769_vm0 }
 0x21a   : > { %721 = vst.msk [vmem:[#allocation2 + $0x4] sm:$0xf] %vm434_vm8, %v720_v54  ;;  %v690_v55 = vld [vmem:[#allocation2] sm:$0xf]  ;;  %vm1770_vm8 = vmmov %vm1769_vm0 }
 0x21b   : > { %v691_v56 = vunpack.c.l.bf16 %v690_v55 }
 0x21d   : > { %v695_v58 = vadd.f32 %v693_v57, %v691_v56 }
 0x21f   : > { %v696_v60 = vpack.c.bf16 %v695_v58, %v695_v58 }
 0x221   : > { %v722_v61 = vld [vmem:[#allocation2 + $0x4] sm:$0xff]  ;;  %697 = vst.msk [vmem:[#allocation2] sm:$0xf] %vm1766_vm1, %v696_v60  ;;  %vm1773_vm1 = vmmov %vm1769_vm0 }
 0x222   : > { %v723_v62 = vunpack.c.l.bf16 %v722_v61  ;;  %v724_v63 = vunpack.c.h.bf16 %v722_v61 }
 0x224   : > { %v728_v1 = vadd.f32 %v726_v0, %v723_v62  ;;  %v729_v2 = vadd.f32 %v726_v0, %v724_v63 }
 0x226   : > { %v1348_v3 = vpack.c.bf16 %v729_v2, %v728_v1 }
 0x228   : > { %738 = vst.msk [vmem:[#allocation2 + $0x4] sm:$0xff] %vm1640_vm10, %v1348_v3  ;;  %vm764_vm10 = vcmask 1039360  }
 0x22f   : > { %v739_v4 = vld [vmem:[#allocation2 + $0x8] sm:$0xf]  ;;  %v1674_v5 = vld [vmem:[#allocation2] sm:$0xff] }
 0x230   : > { %v740_v6 = vunpack.c.l.bf16 %v739_v4  ;;  %756 = vrot.lane.b32.xlu0 %v1674_v5, %s1477_s22 }
 0x232   : > { %v744_v8 = vadd.f32 %v742_v7, %v740_v6 }
 0x234   : > { %v745_v9 = vpack.c.bf16 %v744_v8, %v744_v8  ;;  %774 = vrot.lane.b32.xlu0 %v1674_v5, %s1478_s26 }
 0x236   : > { %746 = vst.msk [vmem:[#allocation2 + $0x8] sm:$0xf] %vm479_vm6, %v745_v9  ;;  %vm866_vm6 = vcmask 744448  }
 0x238   : > { %791 = vrot.lane.b32.xlu0 %v1674_v5, %s1479_s9 }
 0x23c   : > { %808 = vrot.lane.b32.xlu0 %v1674_v5, %s1481_s10 }
 0x23d   : > { %v753_v10 = vld [vmem:[#allocation2 + $0x8] sm:$0xf] }
 0x23e   : > { %758 = vrot.lane.b32.xlu1 %v753_v10, %s1477_s22  ;;  %v748_v11 = vld [vmem:[#allocation2 + $0x8] sm:$0xf] }
 0x23f   : > { %751 = vst.msk [vmem:[#allocation3 + $0x8] sm:$0xf] %vm750_vm3, %v748_v11  ;;  %v771_v12 = vld [vmem:[#allocation2 + $0x8] sm:$0xf] }
 0x240   : > { %825 = vrot.lane.b32.xlu0 %v1674_v5, %s1482_s11  ;;  %v788_v13 = vld [vmem:[#allocation2 + $0x8] sm:$0xf] }
 0x241   : > { %v805_v14 = vld [vmem:[#allocation2 + $0x8] sm:$0xf] }
 0x242   : > { %776 = vrot.lane.b32.xlu1 %v771_v12, %s1478_s26  ;;  %v822_v15 = vld [vmem:[#allocation2 + $0x8] sm:$0xf] }
 0x243   : > { %v839_v17 = vld [vmem:[#allocation2 + $0x8] sm:$0xf] }
 0x244   : > { %842 = vrot.lane.b32.xlu0 %v1674_v5, %s1483_s12  ;;  %v856_v18 = vld [vmem:[#allocation2 + $0x8] sm:$0xf] }
 0x245   : > { %v873_v19 = vld [vmem:[#allocation2 + $0x8] sm:$0xf] }
 0x246   : > { %793 = vrot.lane.b32.xlu1 %v788_v13, %s1479_s9 }
 0x248   : > { %859 = vrot.lane.b32.xlu0 %v1674_v5, %s1484_s13 }
 0x24a   : > { %810 = vrot.lane.b32.xlu1 %v805_v14, %s1481_s10 }
 0x24c   : > { %876 = vrot.lane.b32.xlu0 %v1674_v5, %s1485_s14 }
 0x24e   : > { %827 = vrot.lane.b32.xlu1 %v822_v15, %s1482_s11 }
 0x250   : > { %911 = vperm.xlu0 %1433, %v908_v16  }
 0x252   : > { %844 = vrot.lane.b32.xlu1 %v839_v17, %s1483_s12 }
 0x256   : > { %861 = vrot.lane.b32.xlu1 %v856_v18, %s1484_s13 }
 0x25a   : > { %878 = vrot.lane.b32.xlu1 %v873_v19, %s1485_s14 }
 0x2a2   : > { %v757_v20 = vpop.permute.xlu0 %756 }
 0x2a3   : > { %v760_v25 = vrot.slane %v757_v20, 4 }
 0x2a6   : > { %v775_v21 = vpop.permute.xlu0 %774 }
 0x2a7   : > { %v778_v31 = vrot.slane %v775_v21, 4 }
 0x2aa   : > { %v792_v23 = vpop.permute.xlu0 %791 }
 0x2ab   : > { %v795_v40 = vrot.slane %v792_v23, 4 }
 0x2ae   : > { %v809_v27 = vpop.permute.xlu0 %808 }
 0x2af   : > { %v812_v45 = vrot.slane %v809_v27, 4 }
 0x2b0   : > { %v759_v24 = vpop.permute.xlu1 %758 }
 0x2b1   : > { %v761_v26 = vrot.slane %v759_v24, 4  ;;  %769 = vst.msk [vmem:[#allocation3 + $0x14] sm:$0xf] %vm750_vm3, %v759_v24 }
 0x2b2   : > { %v826_v36 = vpop.permute.xlu0 %825 }
 0x2b3   : > { %v763_v28 = vsel %vm1767_vm11, %v760_v25, %v761_v26  ;;  %v829_v54 = vrot.slane %v826_v36, 4  ;;  %vm1775_vm11 = vmmov %vm1769_vm0  ;;  %v1080_v25 = vadd.s32 128, %v1592_v22  ;;  %v1081_v26 = vadd.s32 256, %v1592_v22 }
 0x2b4   : > { %v765_v29 = vsel %vm764_vm10, %v757_v20, %v763_v28  ;;  %v777_v30 = vpop.permute.xlu1 %776  ;;  %vm1774_vm10 = vmmov %vm1769_vm0  ;;  %v889_v20 = vld [vmem:[%s1754_s4] sm:$0xf] }
 0x2b5   : > { %v779_v32 = vrot.slane %v777_v30, 4  ;;  %786 = vst.msk [vmem:[#allocation3 + $0x20] sm:$0xf] %vm750_vm3, %v777_v30  ;;  %v1306_v33 = vcombine.high %v1674_v5, %v765_v29  ;;  %v1305_v34 = vcombine.low %v1674_v5, %v765_v29 }
 0x2b6   : > { %v843_v49 = vpop.permute.xlu0 %842  ;;  %v1725_v29 = vmul.u32.u64.low 3817748708, %v1080_v25  ;;  %v1726_v30 = vmul.u32.u64.high 3817748708, %v1080_v25, %v1725_v29 }
 0x2b7   : > { %v780_v35 = vsel %vm1768_vm14, %v778_v31, %v779_v32  ;;  %999 = vmatprep.subr.bf16.mxu1 %v1306_v33  ;;  %v846_v61 = vrot.slane %v843_v49, 4  ;;  %vm986_vm14 = vcmask 588800  }
 0x2b8   : > { %v782_v37 = vsel %vm781_vm12, %v775_v21, %v780_v35  ;;  %v794_v38 = vpop.permute.xlu1 %793  ;;  %v1437_v39 = vld [vmem:[#allocation3 + $0x8] ss:$12 sps:$4 sm:$0xff]   ;;  %1000 = vmatpush1.bf16.msra.mxu1 %v1305_v34  ;;  %vm1776_vm12 = vmmov %vm1769_vm0  ;;  %v1728_v31 = vmul.u32.u64.low 3817748708, %v1081_v26  ;;  %v1729_v32 = vmul.u32.u64.high 3817748708, %v1081_v26, %v1728_v31  ;;  %v1099_v34 = vshrl.u32 %v1726_v30, 4 }
 0x2b9   : > { %v796_v41 = vrot.slane %v794_v38, 4  ;;  %803 = vst.msk [vmem:[#allocation3 + $0x2c] sm:$0xf] %vm750_vm3, %v794_v38  ;;  %1367 = vmatpush3.bf16.msra.mxu0 %v1437_v39 }
 0x2ba   : > { %1368 = vmatprep.subr.bf16.mxu0 %v1480_v59  ;;  %v860_v57 = vpop.permute.xlu0 %859  ;;  %v1110_v35 = vshrl.u32 %v1729_v32, 4 }
 0x2bb   : > { %v797_v42 = vsel %vm1769_vm0, %v795_v40, %v796_v41  ;;  %v863_v5 = vrot.slane %v860_v57, 4 }
 0x2bc   : > { %v799_v43 = vsel %vm798_vm15, %v792_v23, %v797_v42  ;;  %v811_v44 = vpop.permute.xlu1 %810  ;;  %vm1777_vm15 = vmmov %vm1769_vm0  ;;  %v1111_v38 = vmul.u32 18, %v1110_v35 }
 0x2bd   : > { %v813_v46 = vrot.slane %v811_v44, 4  ;;  %820 = vst.msk [vmem:[#allocation3 + $0x38] sm:$0xf] %vm750_vm3, %v811_v44  ;;  %v1309_v47 = vcombine.high %v782_v37, %v799_v43  ;;  %v1308_v48 = vcombine.low %v782_v37, %v799_v43  ;;  %v1100_v37 = vmul.u32 18, %v1099_v34 }
 0x2be   : > { %v877_v7 = vpop.permute.xlu0 %876  ;;  %v1112_v41 = vsub.s32 %v1081_v26, %v1111_v38 }
 0x2bf   : > { %v814_v50 = vsel %vm1770_vm8, %v812_v45, %v813_v46  ;;  %1001 = vmatprep.subr.bf16.mxu1 %v1309_v47  ;;  %v880_v11 = vrot.slane %v877_v7, 4  ;;  %v1101_v40 = vsub.s32 %v1080_v25, %v1100_v37 }
 0x2c0   : > { %v816_v51 = vsel %vm815_vm7, %v809_v27, %v814_v50  ;;  %v828_v52 = vpop.permute.xlu1 %827  ;;  %v1438_v53 = vld [vmem:[#allocation3 + $0x20] ss:$12 sps:$4 sm:$0xff]   ;;  %1002 = vmatpush1.bf16.msra.mxu1 %v1308_v48  ;;  %v1722_v27 = vmul.u32.u64.low 3817748708, %v1592_v22  ;;  %v1723_v28 = vmul.u32.u64.high 3817748708, %v1592_v22, %v1722_v27  ;;  %v1126_v44 = vadd.s32 18, %v1112_v41 }
 0x2c1   : > { %v830_v55 = vrot.slane %v828_v52, 4  ;;  %837 = vst.msk [vmem:[#allocation3 + $0x44] sm:$0xf] %vm750_vm3, %v828_v52  ;;  %1369 = vmatpush3.bf16.msra.mxu0 %v1438_v53  ;;  %vm1116_vm8 = vcmp.ne.s32.totalorder %v1101_v40, 0  ;;  %v1125_v43 = vadd.s32 18, %v1101_v40 }
 0x2c2   : > { %1370 = vmatprep.subr.bf16.mxu0 %v1480_v59  ;;  %v1088_v33 = vshrl.u32 %v1723_v28, 4 }
 0x2c3   : > { %v831_v56 = vsel %vm1771_vm9, %v829_v54, %v830_v55 }
 0x2c4   : > { %v833_v58 = vsel %vm832_vm2, %v826_v36, %v831_v56  ;;  %v845_v60 = vpop.permute.xlu1 %844  ;;  %v1089_v36 = vmul.u32 18, %v1088_v33  ;;  %vm1119_vm2 = vcmp.lt.s32.totalorder %v1101_v40, 0 }
 0x2c5   : > { %v847_v62 = vrot.slane %v845_v60, 4  ;;  %854 = vst.msk [vmem:[#allocation3 + $0x50] sm:$0xf] %vm750_vm3, %v845_v60  ;;  %v1312_v63 = vcombine.high %v816_v51, %v833_v58  ;;  %v1311_v0 = vcombine.low %v816_v51, %v833_v58 }
 0x2c6   : > { %v1090_v39 = vsub.s32 %v1592_v22, %v1089_v36 }
 0x2c7   : > { %v848_v1 = vsel %vm1772_vm4, %v846_v61, %v847_v62  ;;  %1003 = vmatprep.subr.bf16.mxu1 %v1312_v63  ;;  %vm1120_vm4 = vcmp.lt.s32.totalorder %v1112_v41, 0 }
 0x2c8   : > { %v850_v2 = vsel %vm849_vm13, %v843_v49, %v848_v1  ;;  %v862_v3 = vpop.permute.xlu1 %861  ;;  %v1439_v4 = vld [vmem:[#allocation3 + $0x38] ss:$12 sps:$4 sm:$0xff]   ;;  %1004 = vmatpush1.bf16.msra.mxu1 %v1311_v0  ;;  %vm1115_vm0 = vcmp.ne.s32.totalorder %v1090_v39, 0  ;;  %vm1118_vm7 = vcmp.lt.s32.totalorder %v1090_v39, 0  ;;  %v1124_v42 = vadd.s32 18, %v1090_v39 }
 0x2c9   : > { %v864_v6 = vrot.slane %v862_v3, 4  ;;  %871 = vst.msk [vmem:[#allocation3 + $0x5c] sm:$0xf] %vm750_vm3, %v862_v3  ;;  %1371 = vmatpush3.bf16.msra.mxu0 %v1439_v4  ;;  %vm1121_vm9 = vmand %vm1118_vm7, %vm1115_vm0  ;;  %vm1117_vm13 = vcmp.ne.s32.totalorder %v1112_v41, 0 }
 0x2ca   : > { %1372 = vmatprep.subr.bf16.mxu0 %v1480_v59  ;;  %v1127_v45 = vsel %vm1121_vm9, %v1124_v42, %v1090_v39 }
 0x2cb   : > { %v865_v8 = vsel %vm1773_vm1, %v863_v5, %v864_v6  ;;  %vm1123_vm1 = vmand %vm1120_vm4, %vm1117_vm13 }
 0x2cc   : > { %v867_v9 = vsel %vm866_vm6, %v860_v57, %v865_v8  ;;  %v879_v10 = vpop.permute.xlu1 %878  ;;  %vm1122_vm6 = vmand %vm1119_vm2, %vm1116_vm8  ;;  %v1129_v47 = vsel %vm1123_vm1, %v1126_v44, %v1112_v41 }
 0x2cd   : > { %v881_v12 = vrot.slane %v879_v10, 4  ;;  %888 = vst.msk [vmem:[#allocation3 + $0x68] sm:$0xf] %vm750_vm3, %v879_v10  ;;  %v1315_v13 = vcombine.high %v850_v2, %v867_v9  ;;  %v1314_v14 = vcombine.low %v850_v2, %v867_v9  ;;  %v1128_v46 = vsel %vm1122_vm6, %v1125_v43, %v1101_v40 }
 0x2cf   : > { %v882_v15 = vsel %vm1774_vm10, %v880_v11, %v881_v12  ;;  %1005 = vmatprep.subr.bf16.mxu1 %v1315_v13  ;;  %vm1131_vm10 = vcmp.lt.s32.totalorder %v1128_v46, 16  ;;  %v912_v22 = vpop.permute.xlu0 %911 }
 0x2d0   : > { %v884_v16 = vsel %vm883_vm5, %v877_v7, %v882_v15  ;;  %v1440_v17 = vld [vmem:[#allocation3 + $0x50] ss:$12 sps:$4 sm:$0xff]   ;;  %1006 = vmatpush1.bf16.msra.mxu1 %v1314_v14  ;;  %vm1130_vm5 = vcmp.lt.s32.totalorder %v1127_v45, 16  ;;  %v1324_v52 = vsel %vm1131_vm10, 1.0, %v1480_v59 }
 0x2d1   : > { %v1318_v18 = vcombine.high %v884_v16, %v884_v16  ;;  %v1317_v19 = vcombine.low %v884_v16, %v884_v16  ;;  %1373 = vmatpush3.bf16.msra.mxu0 %v1440_v17  ;;  %v1323_v49 = vsel %vm1130_vm5, 1.0, %v1480_v59 }
 0x2d2   : > { %1374 = vmatprep.subr.bf16.mxu0 %v1480_v59 }
 0x2d3   : > { %1320 = vmatprep.subr.msk.bf16.mxu1 %vm1775_vm11, %v1318_v18  ;;  %v991_v21 = vsel %vm1776_vm12, %v1317_v19, 0  ;;  %vm1132_vm11 = vcmp.lt.s32.totalorder %v1129_v47, 16  ;;  %vm1143_vm12 = vcmask 261120  }
 0x2d4   : > { %v1441_v23 = vld [vmem:[#allocation3 + $0x68] ss:$0 sps:$4 sm:$0xff]   ;;  %1008 = vmatpush1.bf16.msra.mxu1 %v991_v21  ;;  %v1325_v58 = vsel %vm1132_vm11, 1.0, %v1480_v59 }
 0x2d5   : > { %v997_v24 = vsel %vm1777_vm15, %v1441_v23, 0  ;;  %vm1158_vm15 = vcmask 15368  }
 0x2d6   : > { %1375 = vmatpush3.bf16.msra.mxu0 %v997_v24 }
 0x2d7   : > { %1321 = vmatmul.mubr.msk.bf16.vlgmr.msra.gmra.mrb[0].mxu1 %vm986_vm14, %v889_v20 }
 0x2d9   : > { %1377 = vmatmul.mubr.msk.bf16.vlgmr.msra.gmra.mrb[4].mxu0 %vm986_vm14, %v889_v20  ;;  %vm1148_vm14 = vcmask 7168  }
 0x3aa   : > { %v1033_v48 = vpop.f32.mrb[0].mxu1 }
 0x3ab   : > { %v1034_v50 = vadd.f32 %v1033_v48, %v912_v22  ;;  %v1035_v51 = vpop.f32.mrb[1].mxu1 }
 0x3ac   : > { %v1036_v53 = vadd.f32 %v1035_v51, %v912_v22  ;;  %v1037_v54 = vpop.f32.mrb[2].mxu1  ;;  %v1074_v55 = vpop.f32.mrb[4].mxu0 }
 0x3ad   : > { %v1139_v56 = vmul.f32 %v1323_v49, %v1034_v50  ;;  %v1038_v57 = vpop.f32.mrb[3].mxu1  ;;  %v1075_v60 = vadd.f32 %v1074_v55, %v912_v22  ;;  %v1378_v61 = vpop.f32.mrb[5].mxu0 }
 0x3ae   : > { %v1140_v62 = vmul.f32 %v1324_v52, %v1036_v53  ;;  %v1349_v63 = vpack.c.bf16 %v1036_v53, %v1034_v50  ;;  %v1077_v1 = vpop.f32.mrb[6].mxu0 }
 0x3af   : > { %v1150_v0 = vmul.f32 %v1139_v56, %v1034_v50  ;;  %v1350_v2 = vpack.c.bf16 %v1075_v60, %v1075_v60  ;;  %v1379_v4 = vpop.f32.mrb[7].mxu0  ;;  %v1141_v5 = vmul.f32 %v1325_v58, %v1075_v60 }
 0x3b0   : > { %v1151_v3 = vmul.f32 %v1140_v62, %v1036_v53  ;;  %1173 = vst [vmem:[%s302_s23] sm:$0xff] %v1349_v63  ;;  %v1142_v6 = vadd.f32 %v1140_v62, %v1139_v56 }
 0x3b1   : > { %1174 = vst.msk [vmem:[%s302_s23 + $0x8] sm:$0xf] %vm750_vm3, %v1350_v2  ;;  %v1144_v7 = vsel %vm1143_vm12, %v1141_v5, 0.0  ;;  %v1152_v8 = vmul.f32 %v1141_v5, %v1075_v60 }
 0x3b2   : > { %v1153_v9 = vadd.f32 %v1151_v3, %v1150_v0  ;;  %v1145_v59 = vadd.f32 %v1144_v7, %v1142_v6 }
 0x3b3   : > { %v1154_v10 = vsel %vm1143_vm12, %v1152_v8, 0.0 }
 0x3b4   : > { %1146 = vadd.xlane.f32.xlu1 %v1145_v59  ;;  %v1155_v11 = vadd.f32 %v1154_v10, %v1153_v9 }
 0x3b6   : > { %1156 = vadd.xlane.f32.xlu0 %v1155_v11 }
 0x441   : > { %v1147_v12 = vpop.xlane.xlu1 %1146 }
 0x442   : > { %1149 = vst.msk [vmem:[%s306_s30] sm:$0xff] %vm1148_vm14, %v1147_v12 }
 0x443   : > { %v1157_v13 = vpop.xlane.xlu0 %1156 }
 0x444   : > { %1159 = vst.msk [vmem:[%s306_s30] sm:$0xff] %vm1158_vm15, %v1157_v13 }
 0x445 PF: > { %s18_s24 = sadd.s32 1, %s1448_s24  }
 0x446   : > { %p15_p4 = scmp.ge.s32.totalorder %s18_s24, 4  }
 0x448   :  { %17 = sbr.rel (!%p15_p4) target bundleno = 1 (0x1), region = 89 }

</bundles_post_ra>
